<compile_context>
chip_gen: v7x
topology: tpu7x:2x2x1
jax: 0.10.0
libtpu: 0.0.40
codegen_flags: <defaults>
</compile_context>

<pallas_src>
import functools

import jax
import jax.numpy as jnp
from jax.experimental import pallas as pl
from jax.experimental.pallas import tpu as pltpu

# Small, self-consistent hyperparameters (the original globals xout_size / hs_d*
# are undefined in the source file; FashionMNIST implies a flattened image input).
XOUT_SIZE = 256   # flattened input features
HS1 = 128
HS2 = 64
HS3 = 32
N_CLASSES = 10
BATCH = 256
LEAKY_SLOPE = 0.2

LANE = 128
H_PAD = 128       # lane-dense padded width for hidden layers and the output


def _round_up(n, m):
    return ((n + m - 1) // m) * m


def _pad2d(a, rows, cols):
    return jnp.pad(a, ((0, rows - a.shape[0]), (0, cols - a.shape[1])))


def _leaky_relu(v):
    # Identical to where(v>=0, v, 0.2*v) for slope in (0,1); one fewer VALU op.
    return jnp.maximum(v, LEAKY_SLOPE * v)


def _num_tensorcores():
    """2 TensorCores per chip on v7x, 1 on v5e/v6e. Safe fallback: 1."""
    try:
        kind = jax.devices()[0].device_kind.lower()
        if "v7" in kind or "7x" in kind:
            return 2
    except Exception:
        pass
    return 1


def _mlp_kernel(x_ref, w_ref, b_ref, o_ref, *, in_pad):
    # x_ref: (TB, in_pad) f32
    # w_ref: (in_pad + 3*H_PAD, H_PAD) bf16  -- [W1; W2; W3; W4] packed on rows
    # b_ref: (8, H_PAD) f32                  -- rows 0..3 are b1..b4
    # o_ref: (TB, H_PAD) f32                 -- lane-dense padded logits
    #
    # Cast happens here (not in the wrapper): VPU convert hidden under the MXU.
    x = x_ref[...].astype(jnp.bfloat16)
    b = b_ref[...]

    o1 = in_pad
    o2 = in_pad + H_PAD
    o3 = in_pad + 2 * H_PAD

    h = jnp.dot(x, w_ref[0:o1, :], preferred_element_type=jnp.float32) + b[0:1, :]
    h = _leaky_relu(h)

    h = jnp.dot(h.astype(jnp.bfloat16), w_ref[o1:o2, :],
                preferred_element_type=jnp.float32) + b[1:2, :]
    h = _leaky_relu(h)

    h = jnp.dot(h.astype(jnp.bfloat16), w_ref[o2:o3, :],
                preferred_element_type=jnp.float32) + b[2:3, :]
    h = _leaky_relu(h)

    out = jnp.dot(h.astype(jnp.bfloat16), w_ref[o3:, :],
                  preferred_element_type=jnp.float32) + b[3:4, :]
    o_ref[...] = out.astype(o_ref.dtype)


def pack_params(params):
    """Pad every layer to 128 lanes, pack weights/biases into two buffers (done once)."""
    (w1, b1), (w2, b2), (w3, b3), (w4, b4) = params
    in_pad = _round_up(w1.shape[0], LANE)

    w1p = _pad2d(w1, in_pad, H_PAD)
    w2p = _pad2d(w2, H_PAD, H_PAD)
    w3p = _pad2d(w3, H_PAD, H_PAD)
    w4p = _pad2d(w4, H_PAD, H_PAD)
    wpack = jnp.concatenate([w1p, w2p, w3p, w4p], axis=0).astype(jnp.bfloat16)

    bpack = jnp.zeros((8, H_PAD), jnp.float32)
    for i, bb in enumerate((b1, b2, b3, b4)):
        bpack = bpack.at[i, : bb.shape[-1]].set(bb.reshape(-1))
    return wpack, bpack


def fmnist_classifier_forward(x, wpack, bpack, *, max_tile_rows=1024, num_cores=None):
    B, F = x.shape
    in_pad = wpack.shape[0] - 3 * H_PAD
    assert _round_up(F, LANE) == in_pad, "packed params do not match input width"

    if num_cores is None:
        num_cores = _num_tensorcores()

    # One big batch tile per TensorCore (amortizes per-step overhead + MXU drain);
    # cap tile rows so very large batches still pipeline over HBM.
    rows = max(8, _round_up(B, 8))
    tb = min(_round_up(pl.cdiv(rows, num_cores), 8), max_tile_rows)
    grid_b = pl.cdiv(rows, tb)
    b_pad = grid_b * tb

    # Pad only if strictly necessary (no wrapper-side op on x for aligned shapes);
    # x stays f32 — the bf16 cast happens inside the kernel.
    xp = x if (b_pad == B and in_pad == F) else _pad2d(x, b_pad, in_pad)

    kernel = functools.partial(_mlp_kernel, in_pad=in_pad)

    out_padded = pl.pallas_call(
        kernel,
        out_shape=jax.ShapeDtypeStruct((b_pad, H_PAD), jnp.float32),
        grid_spec=pl.GridSpec(
            grid=(grid_b,),
            in_specs=[
                pl.BlockSpec((tb, in_pad), lambda i: (i, 0)),   # activations: tiled on batch
                pl.BlockSpec(wpack.shape, lambda i: (0, 0)),    # packed weights: VMEM-resident
                pl.BlockSpec(bpack.shape, lambda i: (0, 0)),    # packed biases: VMEM-resident
            ],
            out_specs=pl.BlockSpec((tb, H_PAD), lambda i: (i, 0)),
        ),
        compiler_params=pltpu.CompilerParams(
            dimension_semantics=("parallel",)),                 # shards tiles across v7x's 2 TCs
    )(xp, wpack, bpack)

    return out_padded[:B, :N_CLASSES]


def init_params(key):
    """Deterministic init mimicking PyTorch nn.Linear default: U(-1/sqrt(fan_in), +1/sqrt(fan_in))."""
    dims = [(XOUT_SIZE, HS1), (HS1, HS2), (HS2, HS3), (HS3, N_CLASSES)]
    params = []
    keys = jax.random.split(key, 2 * len(dims))
    for idx, (fan_in, fan_out) in enumerate(dims):
        bound = 1.0 / jnp.sqrt(jnp.float32(fan_in))
        w = jax.random.uniform(keys[2 * idx], (fan_in, fan_out),
                               minval=-bound, maxval=bound, dtype=jnp.float32)
        b = jax.random.uniform(keys[2 * idx + 1], (1, fan_out),
                               minval=-bound, maxval=bound, dtype=jnp.float32)
        params.append((w, b))
    return params


def reference_forward(x, params):
    """Pure-JAX reference using the same bf16-inputs / f32-accumulate numerics."""
    h = x
    for i, (w, b) in enumerate(params):
        h = jnp.dot(h.astype(jnp.bfloat16), w.astype(jnp.bfloat16),
                    preferred_element_type=jnp.float32) + b
        if i < len(params) - 1:
            h = jnp.maximum(h, LEAKY_SLOPE * h)
    return h


if __name__ == "__main__":
    key = jax.random.PRNGKey(0)
    k_x, k_p = jax.random.split(key)

    x = jax.random.normal(k_x, (BATCH, XOUT_SIZE), dtype=jnp.float32)
    params = init_params(k_p)
    wpack, bpack = pack_params(params)   # one-time packing / padding / bf16 cast

    out = fmnist_classifier_forward(x, wpack, bpack)
    out = jax.block_until_ready(out)

    ref = reference_forward(x, params)
    assert out.shape == (BATCH, N_CLASSES)
    assert jnp.allclose(out, ref, atol=1e-2, rtol=1e-2), \
        f"max abs diff {jnp.max(jnp.abs(out - ref))}"

    # TODO(synk): training loop / CrossEntropyLoss / Adam from FMnist_classifier are
    # host-side training utilities, not part of the forward kernel.
    print("KERNEL_OK")
</pallas_src>

<mosaic_0001>
module attributes {stable_mosaic.version = 11 : i64} {
  func.func @_mlp_kernel(%arg0: i32, %arg1: memref<256x256xf32, #tpu.memory_space<vmem>>, %arg2: memref<640x128xbf16, #tpu.memory_space<vmem>>, %arg3: memref<8x128xf32, #tpu.memory_space<vmem>>, %arg4: memref<256x128xf32, #tpu.memory_space<vmem>>) attributes {dimension_semantics = [#tpu.dimension_semantics<parallel>], iteration_bounds = array<i64: 1>, scalar_prefetch = 0 : i64, scratch_operands = 0 : i64, tpu.core_type = #tpu.core_type<tc>, window_params = [{transform_indices = @transform_0, window_bounds = array<i64: 256, 256>}, {pipeline_mode = #tpu.pipeline_mode<synchronous>, transform_indices = @transform_1, window_bounds = array<i64: 640, 128>}, {pipeline_mode = #tpu.pipeline_mode<synchronous>, transform_indices = @transform_2, window_bounds = array<i64: 8, 128>}, {transform_indices = @transform_3, window_bounds = array<i64: 256, 128>}]} {
    %c0 = arith.constant 0 : index
    %c0_0 = arith.constant 0 : index
    %0 = vector.load %arg1[%c0, %c0_0] : memref<256x256xf32, #tpu.memory_space<vmem>>, vector<256x256xf32>
    %1 = arith.truncf %0 : vector<256x256xf32> to vector<256x256xbf16>
    %c0_1 = arith.constant 0 : index
    %c0_2 = arith.constant 0 : index
    %2 = vector.load %arg3[%c0_1, %c0_2] : memref<8x128xf32, #tpu.memory_space<vmem>>, vector<8x128xf32>
    %c0_3 = arith.constant 0 : index
    %c0_4 = arith.constant 0 : index
    %3 = vector.load %arg2[%c0_3, %c0_4] : memref<640x128xbf16, #tpu.memory_space<vmem>>, vector<256x128xbf16>
    %cst = arith.constant dense<0.000000e+00> : vector<256x128xf32>
    %4 = tpu.matmul %1, %3, %cst {dimension_numbers = #tpu.dot_dimension_numbers<[1], [0], [0], [1], [0, 0, 1, 1], [], []>} : vector<256x256xbf16>, vector<256x128xbf16>, vector<256x128xf32> -> vector<256x128xf32>
    %5 = vector.extract_strided_slice %2 {offsets = [0, 0], sizes = [1, 128], strides = [1, 1]} : vector<8x128xf32> to vector<1x128xf32>
    %6 = vector.broadcast %5 : vector<1x128xf32> to vector<256x128xf32>
    %7 = arith.addf %4, %6 : vector<256x128xf32>
    %cst_5 = arith.constant 2.000000e-01 : f32
    %8 = vector.broadcast %cst_5 : f32 to vector<256x128xf32>
    %9 = arith.mulf %8, %7 : vector<256x128xf32>
    %10 = arith.maximumf %7, %9 : vector<256x128xf32>
    %11 = arith.truncf %10 : vector<256x128xf32> to vector<256x128xbf16>
    %c256 = arith.constant 256 : index
    %c0_6 = arith.constant 0 : index
    %12 = vector.load %arg2[%c256, %c0_6] : memref<640x128xbf16, #tpu.memory_space<vmem>>, vector<128x128xbf16>
    %cst_7 = arith.constant dense<0.000000e+00> : vector<256x128xf32>
    %13 = tpu.matmul %11, %12, %cst_7 {dimension_numbers = #tpu.dot_dimension_numbers<[1], [0], [0], [1], [0, 0, 1, 1], [], []>} : vector<256x128xbf16>, vector<128x128xbf16>, vector<256x128xf32> -> vector<256x128xf32>
    %14 = vector.extract_strided_slice %2 {offsets = [1, 0], sizes = [1, 128], strides = [1, 1]} : vector<8x128xf32> to vector<1x128xf32>
    %15 = vector.broadcast %14 : vector<1x128xf32> to vector<256x128xf32>
    %16 = arith.addf %13, %15 : vector<256x128xf32>
    %cst_8 = arith.constant 2.000000e-01 : f32
    %17 = vector.broadcast %cst_8 : f32 to vector<256x128xf32>
    %18 = arith.mulf %17, %16 : vector<256x128xf32>
    %19 = arith.maximumf %16, %18 : vector<256x128xf32>
    %20 = arith.truncf %19 : vector<256x128xf32> to vector<256x128xbf16>
    %c384 = arith.constant 384 : index
    %c0_9 = arith.constant 0 : index
    %21 = vector.load %arg2[%c384, %c0_9] : memref<640x128xbf16, #tpu.memory_space<vmem>>, vector<128x128xbf16>
    %cst_10 = arith.constant dense<0.000000e+00> : vector<256x128xf32>
    %22 = tpu.matmul %20, %21, %cst_10 {dimension_numbers = #tpu.dot_dimension_numbers<[1], [0], [0], [1], [0, 0, 1, 1], [], []>} : vector<256x128xbf16>, vector<128x128xbf16>, vector<256x128xf32> -> vector<256x128xf32>
    %23 = vector.extract_strided_slice %2 {offsets = [2, 0], sizes = [1, 128], strides = [1, 1]} : vector<8x128xf32> to vector<1x128xf32>
    %24 = vector.broadcast %23 : vector<1x128xf32> to vector<256x128xf32>
    %25 = arith.addf %22, %24 : vector<256x128xf32>
    %cst_11 = arith.constant 2.000000e-01 : f32
    %26 = vector.broadcast %cst_11 : f32 to vector<256x128xf32>
    %27 = arith.mulf %26, %25 : vector<256x128xf32>
    %28 = arith.maximumf %25, %27 : vector<256x128xf32>
    %29 = arith.truncf %28 : vector<256x128xf32> to vector<256x128xbf16>
    %c512 = arith.constant 512 : index
    %c0_12 = arith.constant 0 : index
    %30 = vector.load %arg2[%c512, %c0_12] : memref<640x128xbf16, #tpu.memory_space<vmem>>, vector<128x128xbf16>
    %cst_13 = arith.constant dense<0.000000e+00> : vector<256x128xf32>
    %31 = tpu.matmul %29, %30, %cst_13 {dimension_numbers = #tpu.dot_dimension_numbers<[1], [0], [0], [1], [0, 0, 1, 1], [], []>} : vector<256x128xbf16>, vector<128x128xbf16>, vector<256x128xf32> -> vector<256x128xf32>
    %32 = vector.extract_strided_slice %2 {offsets = [3, 0], sizes = [1, 128], strides = [1, 1]} : vector<8x128xf32> to vector<1x128xf32>
    %33 = vector.broadcast %32 : vector<1x128xf32> to vector<256x128xf32>
    %34 = arith.addf %31, %33 : vector<256x128xf32>
    %c0_14 = arith.constant 0 : index
    %c0_15 = arith.constant 0 : index
    %35 = vector.load %arg4[%c0_14, %c0_15] : memref<256x128xf32, #tpu.memory_space<vmem>>, vector<256x128xf32>
    tpu.vector_store %arg4[%c0_14, %c0_15], %34 {strides = array<i32>} : memref<256x128xf32, #tpu.memory_space<vmem>>, vector<256x128xf32>,
    return
  }
  func.func @transform_0(%arg0: i32) -> (i32, i32) {
    %c0_i32 = arith.constant 0 : i32
    %c0_i32_0 = arith.constant 0 : i32
    return %arg0, %c0_i32 : i32, i32
  }
  func.func @transform_1(%arg0: i32) -> (i32, i32) {
    %c0_i32 = arith.constant 0 : i32
    %c0_i32_0 = arith.constant 0 : i32
    %c0_i32_1 = arith.constant 0 : i32
    return %c0_i32, %c0_i32_0 : i32, i32
  }
  func.func @transform_2(%arg0: i32) -> (i32, i32) {
    %c0_i32 = arith.constant 0 : i32
    %c0_i32_0 = arith.constant 0 : i32
    %c0_i32_1 = arith.constant 0 : i32
    return %c0_i32, %c0_i32_0 : i32, i32
  }
  func.func @transform_3(%arg0: i32) -> (i32, i32) {
    %c0_i32 = arith.constant 0 : i32
    %c0_i32_0 = arith.constant 0 : i32
    return %arg0, %c0_i32 : i32, i32
  }
}

</mosaic_0001>

<bundles_post_ra>
// kernel: tpu_custom_call.1
= control target key start
LH: loop header
LB: loop body
LE: loop exit
PB: predicated region body
PF: predicated region fallthrough
CT: control target
= control target key end

     0   :  { %8 = vsyncpa [#allocation3], 0  ;;  %s2192_s0 = inlined_call_operand.hbm [shape: f32[256,256], index: 0, kind: input, shape index: {}]   ;;  %s2193_s1 = inlined_call_operand.hbm [shape: bf16[640,128], index: 1, kind: input, shape index: {}]   ;;  %s2194_s2 = inlined_call_operand.hbm [shape: f32[8,128], index: 2, kind: input, shape index: {}]   ;;  %s2195_s3 = inlined_call_operand.hbm [shape: f32[256,128], index: 3, kind: output, shape index: {}]  }
   0x1   :  { %9 = vsyncpa [#allocation6], 0 }
   0x2   :  { %10 = vsyncpa [#allocation4], 0  ;;  %s1951_s12 = smov [#allocation5]   ;;  %s1857_s16 = scalar_lea.hbm %s2193_s1, 5120 }
   0x3   :  { %s28_s13 = sshll.u32 %s1951_s12, 4  ;;  %p1858_p0 = scmp.ne.s32.totalorder %s2193_s1, %s1857_s16  ;;  %s29_s13 = int_to_ptr.vmem [resolvable:$true] %s28_s13 }
   0x4   :  { %p1861_p1 = scmp.lt.u32.totalorder %s1857_s16, %s2193_s1 }
   0x6   :  { %p1863_p2 = pnand %p1861_p1, %p1858_p0 }
   0x8   :  { %1866 = shalt.err (!%p1863_p2)
}
   0x9   :  { %s1867_s21 = scalar_lea.vmem %s29_s13, 5120  ;;  %p1872_p4 = scmp.lt.s32.totalorder %s29_s13, %s29_s13 }
   0xa   :  { %p1868_p3 = scmp.ne.s32.totalorder %s29_s13, %s1867_s21  ;;  %p1873_p5 = scmp.lt.s32.totalorder %s1867_s21, %s1867_s21 }
   0xc   :  { %p1874_p6 = por %p1873_p5, %p1872_p4 }
   0xe   :  { %p1875_p7 = pnand %p1874_p6, %p1868_p3 }
  0x10   :  { %1878 = shalt.err (!%p1875_p7)
}
  0x11   :  { %s1952_s22 = smov 64   ;;  %s1953_s23 = smov 4  }
  0x12   :  { %34 = dma.hbm_to_vmem [thread:$0]  %s2193_s1, 5120, %s29_s13, [#allocation6], %s1952_s22, %s1952_s22, %s1953_s23  }
  0x13   :  { %s1954_s26 = smov [#allocation2]   ;;  %s1879_s30 = scalar_lea.hbm %s2192_s0, 8192 }
  0x14   :  { %s16_s27 = sshll.u32 %s1954_s26, 4  ;;  %p1880_p8 = scmp.ne.s32.totalorder %s2192_s0, %s1879_s30  ;;  %s17_s27 = int_to_ptr.vmem [resolvable:$true] %s16_s27 }
  0x15   :  { %p1883_p9 = scmp.lt.u32.totalorder %s1879_s30, %s2192_s0 }
  0x17   :  { %p1885_p10 = pnand %p1883_p9, %p1880_p8 }
  0x19   :  { %1888 = shalt.err (!%p1885_p10)
}
  0x1a   :  { %s1889_s8 = scalar_lea.vmem %s17_s27, 8192  ;;  %p1894_p12 = scmp.lt.s32.totalorder %s17_s27, %s17_s27 }
  0x1b   :  { %p1890_p11 = scmp.ne.s32.totalorder %s17_s27, %s1889_s8  ;;  %p1895_p13 = scmp.lt.s32.totalorder %s1889_s8, %s1889_s8 }
  0x1d   :  { %p1896_p0 = por %p1895_p13, %p1894_p12 }
  0x1f   :  { %p1897_p1 = pnand %p1896_p0, %p1890_p11 }
  0x21   :  { %1900 = shalt.err (!%p1897_p1)
}
  0x22   :  { %s1955_s1 = smov 256   ;;  %s1956_s9 = smov 16  }
  0x23   :  { %22 = dma.hbm_to_vmem [thread:$0]  %s2192_s0, 8192, %s17_s27, [#allocation3], %s1955_s1, %s1955_s1, %s1956_s9  }
  0x24   :  { %s1957_s12 = smov [#allocation7]   ;;  %s1901_s16 = scalar_lea.hbm %s2194_s2, 128 }
  0x25   :  { %s41_s13 = sshll.u32 %s1957_s12, 4  ;;  %p1902_p2 = scmp.ne.s32.totalorder %s2194_s2, %s1901_s16  ;;  %s42_s13 = int_to_ptr.vmem [resolvable:$true] %s41_s13 }
  0x26   :  { %p1905_p3 = scmp.lt.u32.totalorder %s1901_s16, %s2194_s2 }
  0x28   :  { %p1907_p4 = pnand %p1905_p3, %p1902_p2 }
  0x2a   :  { %1910 = shalt.err (!%p1907_p4)
}
  0x2b   :  { %s1911_s21 = scalar_lea.vmem %s42_s13, 128  ;;  %p1916_p6 = scmp.lt.s32.totalorder %s42_s13, %s42_s13 }
  0x2c   :  { %p1912_p5 = scmp.ne.s32.totalorder %s42_s13, %s1911_s21  ;;  %p1917_p7 = scmp.lt.s32.totalorder %s1911_s21, %s1911_s21 }
  0x2e   :  { %p1918_p8 = por %p1917_p7, %p1916_p6 }
  0x30   :  { %p1919_p9 = pnand %p1918_p8, %p1912_p5 }
  0x32   :  { %1922 = shalt.err (!%p1919_p9)
}
  0x33   :  { %44 = dma.hbm_to_vmem [thread:$0]  %s2194_s2, 128, %s42_s13, [#allocation6]  }
  0x34   :  { %1945 = dma.done.wait [#allocation3], 8192  }
  0x35   :  { %1946 = vsyncadd [#allocation3], 4294959104 }
  0x36   :  { %1947 = dma.done.wait [#allocation6], 5248  }
  0x37   :  { %1948 = vsyncadd [#allocation6], 4294962048  ;;  %v1816_v0 = vld [vmem:[#allocation5 + $0x40] sm:$0xff]   ;;  %v1818_v2 = vld [vmem:[#allocation5 + $0x48] sm:$0xff]   ;;  %s1958_s2 = smov [#allocation8]  }
  0x38   :  { %v1817_v1 = vld [vmem:[#allocation5] sm:$0xff]   ;;  %1462 = vmatprep.subr.bf16.mxu0 %v1816_v0  ;;  %1790 = vmatprep.subr.bf16.mxu1 %v1816_v0  ;;  %v1819_v3 = vld [vmem:[#allocation5 + $0x8] sm:$0xff]   ;;  %v1820_v4 = vld [vmem:[#allocation5 + $0x50] sm:$0xff]   ;;  %s1409_s23 = sshll.u32 %s1958_s2, 4  ;;  %s1410_s23 = int_to_ptr.vmem [resolvable:$true] %s1409_s23 }
  0x39   :  { %1463 = vmatpush3.bf16.msra.mxu0 %v1817_v1  ;;  %1798 = vmatpush3.bf16.msra.mxu1 %v1817_v1  ;;  %v1821_v5 = vld [vmem:[#allocation5 + $0x10] sm:$0xff]   ;;  %v1822_v6 = vld [vmem:[#allocation5 + $0x58] sm:$0xff]   ;;  %v1824_v8 = vld [vmem:[#allocation5 + $0x60] sm:$0xff]   ;;  %s1923_s24 = scalar_lea.vmem %s1410_s23, 4096  ;;  %p1928_p11 = scmp.lt.s32.totalorder %s1410_s23, %s1410_s23 }
  0x3a   :  { %1464 = vmatprep.subr.bf16.mxu0 %v1818_v2  ;;  %1791 = vmatprep.subr.bf16.mxu1 %v1818_v2  ;;  %v1823_v7 = vld [vmem:[#allocation5 + $0x18] sm:$0xff]   ;;  %v1825_v9 = vld [vmem:[#allocation5 + $0x20] sm:$0xff]   ;;  %v1826_v10 = vld [vmem:[#allocation5 + $0x68] sm:$0xff]   ;;  %p1924_p10 = scmp.ne.s32.totalorder %s1410_s23, %s1923_s24  ;;  %p1929_p12 = scmp.lt.s32.totalorder %s1923_s24, %s1923_s24 }
  0x3b   :  { %v56_v11 = vld [vmem:[#allocation2 + $0x8] sm:$0xff]  ;;  %v58_v12 = vld [vmem:[#allocation2 + $0x18] sm:$0xff]  ;;  %v1828_v15 = vld [vmem:[#allocation5 + $0x70] sm:$0xff]  }
  0x3c   :  { %v120_v13 = vpack.c.bf16 %v58_v12, %v56_v11  ;;  %v1827_v14 = vld [vmem:[#allocation5 + $0x28] sm:$0xff]   ;;  %v1829_v16 = vld [vmem:[#allocation5 + $0x30] sm:$0xff]   ;;  %v1830_v17 = vld [vmem:[#allocation5 + $0x78] sm:$0xff]   ;;  %p1930_p13 = por %p1929_p12, %p1928_p11 }
  0x3d   :  { %1465 = vmatpush3.bf16.msra.mxu0 %v1819_v3  ;;  %1799 = vmatpush3.bf16.msra.mxu1 %v1819_v3  ;;  %v1831_v18 = vld [vmem:[#allocation5 + $0x38] sm:$0xff]   ;;  %v55_v19 = vld [vmem:[#allocation2] sm:$0xff]  ;;  %v57_v20 = vld [vmem:[#allocation2 + $0x10] sm:$0xff] }
  0x3e   :  { %1466 = vmatprep.subr.bf16.mxu0 %v1820_v4  ;;  %1792 = vmatprep.subr.bf16.mxu1 %v1820_v4  ;;  %v60_v21 = vld [vmem:[#allocation2 + $0x28] sm:$0xff]  ;;  %v62_v22 = vld [vmem:[#allocation2 + $0x38] sm:$0xff]  ;;  %v119_v25 = vpack.c.bf16 %v57_v20, %v55_v19  ;;  %v103_v27 = vld [vmem:[#allocation2 + $0x180] sm:$0xff]  ;;  %p1931_p0 = pnand %p1930_p13, %p1924_p10 }
  0x3f   :  { %316 = vmatprep.mubr.bf16.mxu0 %v120_v13  ;;  %v104_v23 = vld [vmem:[#allocation2 + $0x188] sm:$0xff]  ;;  %v106_v24 = vld [vmem:[#allocation2 + $0x198] sm:$0xff]  ;;  %v105_v28 = vld [vmem:[#allocation2 + $0x190] sm:$0xff]  ;;  %v122_v29 = vpack.c.bf16 %v62_v22, %v60_v21 }
  0x40   :  { %v144_v26 = vpack.c.bf16 %v106_v24, %v104_v23  ;;  %v143_v30 = vpack.c.bf16 %v105_v28, %v103_v27  ;;  %v108_v31 = vld [vmem:[#allocation2 + $0x1a8] sm:$0xff]  ;;  %v110_v32 = vld [vmem:[#allocation2 + $0x1b8] sm:$0xff]  ;;  %v59_v34 = vld [vmem:[#allocation2 + $0x20] sm:$0xff] }
  0x41   :  { %1467 = vmatpush3.bf16.msra.mxu0 %v1821_v5  ;;  %1800 = vmatpush3.bf16.msra.mxu1 %v1821_v5  ;;  %v146_v33 = vpack.c.bf16 %v110_v32, %v108_v31  ;;  %v61_v35 = vld [vmem:[#allocation2 + $0x30] sm:$0xff]  ;;  %v64_v36 = vld [vmem:[#allocation2 + $0x48] sm:$0xff]  ;;  %v66_v37 = vld [vmem:[#allocation2 + $0x58] sm:$0xff] }
  0x42   :  { %1468 = vmatprep.subr.bf16.mxu0 %v1822_v6  ;;  %1793 = vmatprep.subr.bf16.mxu1 %v1822_v6  ;;  %v107_v38 = vld [vmem:[#allocation2 + $0x1a0] sm:$0xff]  ;;  %v109_v39 = vld [vmem:[#allocation2 + $0x1b0] sm:$0xff]  ;;  %v112_v40 = vld [vmem:[#allocation2 + $0x1c8] sm:$0xff]  ;;  %v121_v42 = vpack.c.bf16 %v61_v35, %v59_v34  ;;  %v124_v44 = vpack.c.bf16 %v66_v37, %v64_v36 }
  0x43   :  { %412 = vmatprep.mubr.bf16.mxu1 %v144_v26  ;;  %v114_v41 = vld [vmem:[#allocation2 + $0x1d8] sm:$0xff]  ;;  %v1832_v43 = vld [vmem:[#allocation5 + $0x80] sm:$0xff]   ;;  %v145_v45 = vpack.c.bf16 %v109_v39, %v107_v38  ;;  %v1833_v46 = vld [vmem:[#allocation5 + $0x88] sm:$0xff]  }
  0x44   :  { %v148_v47 = vpack.c.bf16 %v114_v41, %v112_v40  ;;  %v1834_v48 = vld [vmem:[#allocation5 + $0x90] sm:$0xff]   ;;  %v63_v49 = vld [vmem:[#allocation2 + $0x40] sm:$0xff]  ;;  %v68_v51 = vld [vmem:[#allocation2 + $0x68] sm:$0xff] }
  0x45   :  { %1469 = vmatpush3.bf16.msra.mxu0 %v1823_v7  ;;  %1801 = vmatpush3.bf16.msra.mxu1 %v1823_v7  ;;  %v65_v50 = vld [vmem:[#allocation2 + $0x50] sm:$0xff]  ;;  %v70_v52 = vld [vmem:[#allocation2 + $0x78] sm:$0xff]  ;;  %v111_v53 = vld [vmem:[#allocation2 + $0x1c0] sm:$0xff] }
  0x46   :  { %1470 = vmatprep.subr.bf16.mxu0 %v1824_v8  ;;  %1794 = vmatprep.subr.bf16.mxu1 %v1824_v8  ;;  %v113_v54 = vld [vmem:[#allocation2 + $0x1d0] sm:$0xff]  ;;  %v116_v55 = vld [vmem:[#allocation2 + $0x1e8] sm:$0xff]  ;;  %v118_v56 = vld [vmem:[#allocation2 + $0x1f8] sm:$0xff]  ;;  %v123_v57 = vpack.c.bf16 %v65_v50, %v63_v49  ;;  %v126_v58 = vpack.c.bf16 %v70_v52, %v68_v51 }
  0x47   :  { %v147_v59 = vpack.c.bf16 %v113_v54, %v111_v53  ;;  %v150_v60 = vpack.c.bf16 %v118_v56, %v116_v55  ;;  %v67_v61 = vld [vmem:[#allocation2 + $0x60] sm:$0xff]  ;;  %v69_v62 = vld [vmem:[#allocation2 + $0x70] sm:$0xff]  ;;  %v72_v63 = vld [vmem:[#allocation2 + $0x88] sm:$0xff]  ;;  %v184_v56 = vlaneseq }
  0x48   :  { %v74_v0 = vld [vmem:[#allocation2 + $0x98] sm:$0xff]  ;;  %v115_v1 = vld [vmem:[#allocation2 + $0x1e0] sm:$0xff]  ;;  %v117_v2 = vld [vmem:[#allocation2 + $0x1f0] sm:$0xff]  ;;  %v125_v3 = vpack.c.bf16 %v69_v62, %v67_v61 }
  0x49   :  { %1471 = vmatpush3.bf16.msra.mxu0 %v1825_v9  ;;  %1802 = vmatpush3.bf16.msra.mxu1 %v1825_v9  ;;  %v128_v4 = vpack.c.bf16 %v74_v0, %v72_v63  ;;  %v149_v5 = vpack.c.bf16 %v117_v2, %v115_v1  ;;  %v71_v6 = vld [vmem:[#allocation2 + $0x80] sm:$0xff]  ;;  %v73_v7 = vld [vmem:[#allocation2 + $0x90] sm:$0xff]  ;;  %v76_v8 = vld [vmem:[#allocation2 + $0xa8] sm:$0xff] }
  0x4a   :  { %1472 = vmatprep.subr.bf16.mxu0 %v1826_v10  ;;  %1795 = vmatprep.subr.bf16.mxu1 %v1826_v10  ;;  %v78_v9 = vld [vmem:[#allocation2 + $0xb8] sm:$0xff]  ;;  %v127_v10 = vpack.c.bf16 %v73_v7, %v71_v6  ;;  %v75_v12 = vld [vmem:[#allocation2 + $0xa0] sm:$0xff]  ;;  %v77_v13 = vld [vmem:[#allocation2 + $0xb0] sm:$0xff] }
  0x4b   :  { %v130_v11 = vpack.c.bf16 %v78_v9, %v76_v8  ;;  %v81_v19 = vld [vmem:[#allocation2 + $0xd0] sm:$0xff]  ;;  %v84_v20 = vld [vmem:[#allocation2 + $0xe8] sm:$0xff]  ;;  %v86_v21 = vld [vmem:[#allocation2 + $0xf8] sm:$0xff] }
  0x4c   :  { %v134_v23 = vpack.c.bf16 %v86_v21, %v84_v20  ;;  %v83_v24 = vld [vmem:[#allocation2 + $0xe0] sm:$0xff]  ;;  %v88_v26 = vld [vmem:[#allocation2 + $0x108] sm:$0xff]  ;;  %v90_v27 = vld [vmem:[#allocation2 + $0x118] sm:$0xff] }
  0x4d   :  { %1473 = vmatpush3.bf16.msra.mxu0 %v1827_v14  ;;  %1803 = vmatpush3.bf16.msra.mxu1 %v1827_v14  ;;  %v80_v14 = vld [vmem:[#allocation2 + $0xc8] sm:$0xff]  ;;  %v89_v31 = vld [vmem:[#allocation2 + $0x110] sm:$0xff]  ;;  %v91_v36 = vld [vmem:[#allocation2 + $0x120] sm:$0xff] }
  0x4e   :  { %1474 = vmatprep.subr.bf16.mxu0 %v1828_v15  ;;  %1796 = vmatprep.subr.bf16.mxu1 %v1828_v15  ;;  %v82_v15 = vld [vmem:[#allocation2 + $0xd8] sm:$0xff]  ;;  %v92_v32 = vld [vmem:[#allocation2 + $0x128] sm:$0xff]  ;;  %v93_v37 = vld [vmem:[#allocation2 + $0x130] sm:$0xff] }
  0x4f   :  { %v96_v38 = vld [vmem:[#allocation2 + $0x148] sm:$0xff]  ;;  %v98_v39 = vld [vmem:[#allocation2 + $0x158] sm:$0xff]  ;;  %v137_v40 = vpack.c.bf16 %v93_v37, %v91_v36  ;;  %v101_v49 = vld [vmem:[#allocation2 + $0x170] sm:$0xff] }
  0x50   :  { %v140_v41 = vpack.c.bf16 %v98_v39, %v96_v38  ;;  %v1835_v50 = vld [vmem:[#allocation5 + $0x98] sm:$0xff]   ;;  %v1836_v52 = vld [vmem:[#allocation5 + $0xa0] sm:$0xff]   ;;  %v1837_v53 = vld [vmem:[#allocation5 + $0xa8] sm:$0xff]  }
  0x51   :  { %1475 = vmatpush3.bf16.msra.mxu0 %v1829_v16  ;;  %1804 = vmatpush3.bf16.msra.mxu1 %v1829_v16  ;;  %v129_v16 = vpack.c.bf16 %v77_v13, %v75_v12  ;;  %v1838_v54 = vld [vmem:[#allocation5 + $0xb0] sm:$0xff]   ;;  %v1839_v55 = vld [vmem:[#allocation5 + $0xb8] sm:$0xff]  }
  0x52   :  { %1476 = vmatprep.subr.bf16.mxu0 %v1830_v17  ;;  %1797 = vmatprep.subr.bf16.mxu1 %v1830_v17  ;;  %v132_v17 = vpack.c.bf16 %v82_v15, %v80_v14 }
  0x55   :  { %1477 = vmatpush3.bf16.msra.mxu0 %v1831_v18  ;;  %1805 = vmatpush3.bf16.msra.mxu1 %v1831_v18  ;;  %v79_v18 = vld [vmem:[#allocation2 + $0xc0] sm:$0xff] }
  0x56   :  { %1646 = vmatprep.subr.bf16.mxu1 %v1832_v43  ;;  %v131_v22 = vpack.c.bf16 %v81_v19, %v79_v18 }
  0x58   :  { %317 = vmatmul.mubr.bf16.vlgmr.msra.gmra.mrb[0].mxu0 %v119_v25  ;;  %413 = vmatmul.mubr.bf16.vlgmr.msra.gmra.mrb[0].mxu1 %v143_v30  ;;  %v85_v25 = vld [vmem:[#allocation2 + $0xf0] sm:$0xff]  ;;  %v87_v30 = vld [vmem:[#allocation2 + $0x100] sm:$0xff] }
  0x59   :  { %324 = vmatprep.mubr.bf16.mxu0 %v122_v29  ;;  %420 = vmatprep.mubr.bf16.mxu1 %v146_v33  ;;  %v133_v28 = vpack.c.bf16 %v85_v25, %v83_v24  ;;  %v136_v29 = vpack.c.bf16 %v90_v27, %v88_v26  ;;  %v94_v33 = vld [vmem:[#allocation2 + $0x138] sm:$0xff]  ;;  %v135_v34 = vpack.c.bf16 %v89_v31, %v87_v30 }
  0x5a   :  { %1647 = vmatpush3.bf16.msra.mxu1 %v1832_v43  ;;  %v138_v35 = vpack.c.bf16 %v94_v33, %v92_v32  ;;  %v97_v43 = vld [vmem:[#allocation2 + $0x150] sm:$0xff] }
  0x5b   :  { %1648 = vmatprep.subr.bf16.mxu1 %v1833_v46 }
  0x5e   :  { %1649 = vmatpush3.bf16.msra.mxu1 %v1833_v46 }
  0x5f   :  { %1650 = vmatprep.subr.bf16.mxu1 %v1834_v48 }
  0x60   :  { %325 = vmatmul.mubr.bf16.gmra.mrb[4].mxu0 %v121_v42  ;;  %421 = vmatmul.mubr.bf16.gmra.mrb[4].mxu1 %v145_v45  ;;  %v95_v42 = vld [vmem:[#allocation2 + $0x140] sm:$0xff]  ;;  %v102_v45 = vld [vmem:[#allocation2 + $0x178] sm:$0xff] }
  0x61   :  { %332 = vmatprep.mubr.bf16.mxu0 %v124_v44  ;;  %428 = vmatprep.mubr.bf16.mxu1 %v148_v47  ;;  %v100_v44 = vld [vmem:[#allocation2 + $0x168] sm:$0xff]  ;;  %v139_v46 = vpack.c.bf16 %v97_v43, %v95_v42 }
  0x62   :  { %1651 = vmatpush3.bf16.msra.mxu1 %v1834_v48  ;;  %v142_v47 = vpack.c.bf16 %v102_v45, %v100_v44  ;;  %v99_v48 = vld [vmem:[#allocation2 + $0x160] sm:$0xff] }
  0x63   :  { %v141_v51 = vpack.c.bf16 %v101_v49, %v99_v48  ;;  %1652 = vmatprep.subr.bf16.mxu1 %v1835_v50 }
  0x66   :  { %1653 = vmatpush3.bf16.msra.mxu1 %v1835_v50 }
  0x67   :  { %1654 = vmatprep.subr.bf16.mxu1 %v1836_v52 }
  0x68   :  { %333 = vmatmul.mubr.bf16.gmra.mrb[8].mxu0 %v123_v57  ;;  %429 = vmatmul.mubr.bf16.gmra.mrb[8].mxu1 %v147_v59  ;;  %v2017_v57 = vld [vmem:[#allocation5 + $0xc0] sm:$0xff]  }
  0x69   :  { %340 = vmatprep.mubr.bf16.mxu0 %v126_v58  ;;  %436 = vmatprep.mubr.bf16.mxu1 %v150_v60  ;;  %v2019_v58 = vshrl.u32 %v184_v56, 7  ;;  %v2023_v60 = vld [vmem:[#allocation7] sm:$0xff] }
  0x6a   :  { %1655 = vmatpush3.bf16.msra.mxu1 %v1836_v52 }
  0x6b   :  { %1656 = vmatprep.subr.bf16.mxu1 %v1837_v53  ;;  %v186_v59 = vsub.s32 0, %v2019_v58 }
  0x6d   :  { %v2026_v62 = vrot.slane %v2023_v60, %v186_v59 }
  0x6e   :  { %1657 = vmatpush3.bf16.msra.mxu1 %v1837_v53 }
  0x6f   :  { %1658 = vmatprep.subr.bf16.mxu1 %v1838_v54 }
  0x70   :  { %341 = vmatmul.mubr.bf16.gmra.mrb[12].mxu0 %v125_v3  ;;  %437 = vmatmul.mubr.bf16.gmra.mrb[12].mxu1 %v149_v5 }
  0x71   :  { %348 = vmatprep.mubr.bf16.mxu0 %v128_v4 }
  0x72   :  { %1659 = vmatpush3.bf16.msra.mxu1 %v1838_v54 }
  0x73   :  { %1660 = vmatprep.subr.bf16.mxu1 %v1839_v55 }
  0x76   :  { %1661 = vmatpush3.bf16.msra.mxu1 %v1839_v55 }
  0x77   :  { %1694 = vmatprep.subr.bf16.mxu1 %v2017_v57 }
  0x78   :  { %349 = vmatmul.mubr.bf16.gmra.mrb[16].mxu0 %v127_v10 }
  0x79   :  { %356 = vmatprep.mubr.bf16.mxu0 %v130_v11 }
  0x80   :  { %357 = vmatmul.mubr.bf16.gmra.mrb[20].mxu0 %v129_v16 }
  0x81   :  { %364 = vmatprep.mubr.bf16.mxu0 %v132_v17 }
  0x88   :  { %365 = vmatmul.mubr.bf16.gmra.mrb[24].mxu0 %v131_v22 }
  0x89   :  { %372 = vmatprep.mubr.bf16.mxu0 %v134_v23 }
  0x90   :  { %373 = vmatmul.mubr.bf16.gmra.mrb[28].mxu0 %v133_v28 }
  0x91   :  { %380 = vmatprep.mubr.bf16.mxu0 %v136_v29 }
  0x98   :  { %381 = vmatmul.mubr.bf16.gmra.mrb[32].mxu0 %v135_v34 }
  0x99   :  { %388 = vmatprep.mubr.bf16.mxu0 %v138_v35 }
  0xa0   :  { %389 = vmatmul.mubr.bf16.gmra.mrb[36].mxu0 %v137_v40 }
  0xa1   :  { %396 = vmatprep.mubr.bf16.mxu0 %v140_v41 }
  0xa8   :  { %397 = vmatmul.mubr.bf16.gmra.mrb[40].mxu0 %v139_v46 }
  0xa9   :  { %404 = vmatprep.mubr.bf16.mxu0 %v142_v47 }
  0xb0   :  { %405 = vmatmul.mubr.bf16.gmra.mrb[44].mxu0 %v141_v51 }
 0x12b   :  { %v1478_v61 = vpop.f32.mrb[0].mxu0  ;;  %v1550_v0 = vpop.f32.mrb[0].mxu1 }
 0x12c   :  { %v1479_v63 = vpop.f32.mrb[1].mxu0  ;;  %v1551_v3 = vpop.f32.mrb[1].mxu1 }
 0x12d   :  { %v1480_v1 = vadd.f32 %v1479_v63, %v1478_v61  ;;  %v1481_v2 = vpop.f32.mrb[2].mxu0  ;;  %v1552_v5 = vadd.f32 %v1551_v3, %v1550_v0  ;;  %v1553_v6 = vpop.f32.mrb[2].mxu1 }
 0x12e   :  { %v1482_v4 = vpop.f32.mrb[3].mxu0  ;;  %v1554_v9 = vpop.f32.mrb[3].mxu1 }
 0x12f   :  { %v319_v7 = vadd.f32 %v1480_v1, %v2026_v62  ;;  %v1483_v8 = vadd.f32 %v1482_v4, %v1481_v2  ;;  %v415_v10 = vadd.f32 %v1552_v5, %v2026_v62  ;;  %v1555_v11 = vadd.f32 %v1554_v9, %v1553_v6  ;;  %v1841_v1 = vld [vmem:[#allocation5 + $0xc8] sm:$0xff]  }
 0x131   :  { %v445_v12 = vmul.f32 0.2, %v319_v7  ;;  %v322_v13 = vadd.f32 %v1483_v8, %v2026_v62  ;;  %v469_v14 = vmul.f32 0.2, %v415_v10  ;;  %v418_v15 = vadd.f32 %v1555_v11, %v2026_v62  ;;  %v1842_v11 = vld [vmem:[#allocation5 + $0xd0] sm:$0xff]  }
 0x133   :  { %v446_v16 = vmul.f32 0.2, %v322_v13  ;;  %v1484_v17 = vpop.f32.mrb[4].mxu0  ;;  %v501_v19 = vmax.f32 %v415_v10, %v469_v14  ;;  %v470_v20 = vmul.f32 0.2, %v418_v15  ;;  %v1556_v21 = vpop.f32.mrb[4].mxu1  ;;  %v477_v22 = vmax.f32 %v319_v7, %v445_v12 }
 0x134   :  { %v1485_v18 = vpop.f32.mrb[5].mxu0  ;;  %v1557_v26 = vpop.f32.mrb[5].mxu1 }
 0x135   :  { %v478_v23 = vmax.f32 %v322_v13, %v446_v16  ;;  %v1486_v24 = vadd.f32 %v1485_v18, %v1484_v17  ;;  %v1487_v25 = vpop.f32.mrb[6].mxu0  ;;  %v502_v28 = vmax.f32 %v418_v15, %v470_v20  ;;  %v1558_v29 = vadd.f32 %v1557_v26, %v1556_v21  ;;  %v1559_v30 = vpop.f32.mrb[6].mxu1 }
 0x136   :  { %v1488_v27 = vpop.f32.mrb[7].mxu0  ;;  %v1560_v34 = vpop.f32.mrb[7].mxu1 }
 0x137   :  { %v327_v31 = vadd.f32 %v1486_v24, %v2026_v62  ;;  %v1489_v32 = vadd.f32 %v1488_v27, %v1487_v25  ;;  %v509_v33 = vpack.c.bf16 %v478_v23, %v477_v22  ;;  %v423_v35 = vadd.f32 %v1558_v29, %v2026_v62 }
 0x138   :  { %v1561_v36 = vadd.f32 %v1560_v34, %v1559_v30  ;;  %v2034_v37 = vpack.c.bf16 %v502_v28, %v501_v19  ;;  %v1843_v28 = vld [vmem:[#allocation5 + $0xd8] sm:$0xff]  }
 0x139   :  { %v447_v38 = vmul.f32 0.2, %v327_v31  ;;  %v330_v39 = vadd.f32 %v1489_v32, %v2026_v62  ;;  %1662 = vmatprep.mubr.bf16.mxu1 %v509_v33  ;;  %v471_v40 = vmul.f32 0.2, %v423_v35 }
 0x13a   :  { %v426_v41 = vadd.f32 %v1561_v36, %v2026_v62 }
 0x13b   :  { %v448_v42 = vmul.f32 0.2, %v330_v39  ;;  %v1490_v43 = vpop.f32.mrb[8].mxu0  ;;  %v503_v45 = vmax.f32 %v423_v35, %v471_v40  ;;  %v1562_v47 = vpop.f32.mrb[8].mxu1  ;;  %v479_v48 = vmax.f32 %v327_v31, %v447_v38 }
 0x13c   :  { %v1491_v44 = vpop.f32.mrb[9].mxu0  ;;  %v472_v46 = vmul.f32 0.2, %v426_v41  ;;  %v1563_v52 = vpop.f32.mrb[9].mxu1 }
 0x13d   :  { %v480_v49 = vmax.f32 %v330_v39, %v448_v42  ;;  %v1492_v50 = vadd.f32 %v1491_v44, %v1490_v43  ;;  %v1493_v51 = vpop.f32.mrb[10].mxu0  ;;  %v1564_v55 = vadd.f32 %v1563_v52, %v1562_v47  ;;  %v1565_v56 = vpop.f32.mrb[10].mxu1  ;;  %v1844_v39 = vld [vmem:[#allocation5 + $0xe0] sm:$0xff]  }
 0x13e   :  { %v1494_v53 = vpop.f32.mrb[11].mxu0  ;;  %v504_v54 = vmax.f32 %v426_v41, %v472_v46  ;;  %v1566_v0 = vpop.f32.mrb[11].mxu1 }
 0x13f   :  { %v510_v59 = vpack.c.bf16 %v480_v49, %v479_v48  ;;  %v335_v61 = vadd.f32 %v1492_v50, %v2026_v62  ;;  %v1495_v63 = vadd.f32 %v1494_v53, %v1493_v51  ;;  %v431_v2 = vadd.f32 %v1564_v55, %v2026_v62 }
 0x140   :  { %v1567_v3 = vadd.f32 %v1566_v0, %v1565_v56  ;;  %v2040_v4 = vpack.c.bf16 %v504_v54, %v503_v45 }
 0x141   :  { %v449_v5 = vmul.f32 0.2, %v335_v61  ;;  %v338_v6 = vadd.f32 %v1495_v63, %v2026_v62  ;;  %1663 = vmatmul.mubr.bf16.vlgmr.msra.gmra.mrb[16].mxu1 %v510_v59  ;;  %v473_v7 = vmul.f32 0.2, %v431_v2 }
 0x142   :  { %v434_v8 = vadd.f32 %v1567_v3, %v2026_v62  ;;  %1695 = vmatpush3.bf16.msra.mxu1 %v2017_v57 }
 0x143   :  { %v450_v9 = vmul.f32 0.2, %v338_v6  ;;  %v1496_v10 = vpop.f32.mrb[12].mxu0  ;;  %1696 = vmatprep.subr.bf16.mxu1 %v1841_v1  ;;  %v505_v13 = vmax.f32 %v431_v2, %v473_v7  ;;  %v1568_v15 = vpop.f32.mrb[12].mxu1  ;;  %v481_v16 = vmax.f32 %v335_v61, %v449_v5 }
 0x144   :  { %v1497_v12 = vpop.f32.mrb[13].mxu0  ;;  %v474_v14 = vmul.f32 0.2, %v434_v8  ;;  %v1569_v20 = vpop.f32.mrb[13].mxu1 }
 0x145   :  { %v482_v17 = vmax.f32 %v338_v6, %v450_v9  ;;  %v1498_v18 = vadd.f32 %v1497_v12, %v1496_v10  ;;  %v1499_v19 = vpop.f32.mrb[14].mxu0  ;;  %v1570_v23 = vadd.f32 %v1569_v20, %v1568_v15  ;;  %v1571_v24 = vpop.f32.mrb[14].mxu1 }
 0x146   :  { %v1500_v21 = vpop.f32.mrb[15].mxu0  ;;  %v506_v22 = vmax.f32 %v434_v8, %v474_v14  ;;  %1697 = vmatpush3.bf16.msra.mxu1 %v1841_v1  ;;  %v1572_v27 = vpop.f32.mrb[15].mxu1 }
 0x147   :  { %v343_v57 = vadd.f32 %v1498_v18, %v2026_v62  ;;  %v1501_v25 = vadd.f32 %v1500_v21, %v1499_v19  ;;  %v511_v26 = vpack.c.bf16 %v482_v17, %v481_v16  ;;  %1698 = vmatprep.subr.bf16.mxu1 %v1842_v11  ;;  %v439_v29 = vadd.f32 %v1570_v23, %v2026_v62 }
 0x148   :  { %v1573_v30 = vadd.f32 %v1572_v27, %v1571_v24  ;;  %v2047_v31 = vpack.c.bf16 %v506_v22, %v505_v13 }
 0x149   :  { %v451_v32 = vmul.f32 0.2, %v343_v57  ;;  %v346_v33 = vadd.f32 %v1501_v25, %v2026_v62  ;;  %1666 = vmatprep.mubr.bf16.mxu1 %v511_v26  ;;  %v475_v34 = vmul.f32 0.2, %v439_v29 }
 0x14a   :  { %v442_v35 = vadd.f32 %v1573_v30, %v2026_v62  ;;  %1699 = vmatpush3.bf16.msra.mxu1 %v1842_v11 }
 0x14b   :  { %v452_v36 = vmul.f32 0.2, %v346_v33  ;;  %v1502_v38 = vpop.f32.mrb[16].mxu0  ;;  %1700 = vmatprep.subr.bf16.mxu1 %v1843_v28  ;;  %v507_v41 = vmax.f32 %v439_v29, %v475_v34  ;;  %v483_v43 = vmax.f32 %v343_v57, %v451_v32 }
 0x14c   :  { %v1503_v40 = vpop.f32.mrb[17].mxu0  ;;  %v476_v42 = vmul.f32 0.2, %v442_v35 }
 0x14d   :  { %v484_v44 = vmax.f32 %v346_v33, %v452_v36  ;;  %v1504_v45 = vadd.f32 %v1503_v40, %v1502_v38  ;;  %v1505_v46 = vpop.f32.mrb[18].mxu0 }
 0x14e   :  { %v1506_v47 = vpop.f32.mrb[19].mxu0  ;;  %v508_v48 = vmax.f32 %v442_v35, %v476_v42  ;;  %1701 = vmatpush3.bf16.msra.mxu1 %v1843_v28 }
 0x14f   :  { %v351_v49 = vadd.f32 %v1504_v45, %v2026_v62  ;;  %v1507_v50 = vadd.f32 %v1506_v47, %v1505_v46  ;;  %v512_v51 = vpack.c.bf16 %v484_v44, %v483_v43  ;;  %1702 = vmatprep.subr.bf16.mxu1 %v1844_v39 }
 0x150   :  { %v2052_v52 = vpack.c.bf16 %v508_v48, %v507_v41 }
 0x151   :  { %v453_v53 = vmul.f32 0.2, %v351_v49  ;;  %v354_v54 = vadd.f32 %v1507_v50, %v2026_v62  ;;  %1667 = vmatmul.mubr.bf16.gmra.mrb[20].mxu1 %v512_v51 }
 0x152   :  { %1703 = vmatpush3.bf16.msra.mxu1 %v1844_v39 }
 0x153   :  { %v454_v55 = vmul.f32 0.2, %v354_v54  ;;  %v1508_v56 = vpop.f32.mrb[20].mxu0  ;;  %v485_v61 = vmax.f32 %v351_v49, %v453_v53 }
 0x154   :  { %v1509_v59 = vpop.f32.mrb[21].mxu0 }
 0x155   :  { %v486_v63 = vmax.f32 %v354_v54, %v454_v55  ;;  %v1510_v0 = vadd.f32 %v1509_v59, %v1508_v56  ;;  %v1511_v1 = vpop.f32.mrb[22].mxu0 }
 0x156   :  { %v1512_v2 = vpop.f32.mrb[23].mxu0 }
 0x157   :  { %v359_v3 = vadd.f32 %v1510_v0, %v2026_v62  ;;  %v1513_v5 = vadd.f32 %v1512_v2, %v1511_v1  ;;  %v513_v6 = vpack.c.bf16 %v486_v63, %v485_v61 }
 0x159   :  { %v455_v7 = vmul.f32 0.2, %v359_v3  ;;  %v362_v8 = vadd.f32 %v1513_v5, %v2026_v62  ;;  %1670 = vmatprep.mubr.bf16.mxu1 %v513_v6 }
 0x15b   :  { %v456_v9 = vmul.f32 0.2, %v362_v8  ;;  %v1514_v10 = vpop.f32.mrb[24].mxu0  ;;  %v487_v12 = vmax.f32 %v359_v3, %v455_v7 }
 0x15c   :  { %v1515_v11 = vpop.f32.mrb[25].mxu0 }
 0x15d   :  { %v488_v13 = vmax.f32 %v362_v8, %v456_v9  ;;  %v1516_v14 = vadd.f32 %v1515_v11, %v1514_v10  ;;  %v1517_v15 = vpop.f32.mrb[26].mxu0 }
 0x15e   :  { %v1518_v16 = vpop.f32.mrb[27].mxu0 }
 0x15f   :  { %v367_v17 = vadd.f32 %v1516_v14, %v2026_v62  ;;  %v1519_v18 = vadd.f32 %v1518_v16, %v1517_v15  ;;  %v514_v19 = vpack.c.bf16 %v488_v13, %v487_v12 }
 0x161   :  { %v457_v20 = vmul.f32 0.2, %v367_v17  ;;  %v370_v21 = vadd.f32 %v1519_v18, %v2026_v62  ;;  %1671 = vmatmul.mubr.bf16.gmra.mrb[24].mxu1 %v514_v19 }
 0x163   :  { %v458_v22 = vmul.f32 0.2, %v370_v21  ;;  %v1520_v23 = vpop.f32.mrb[28].mxu0  ;;  %v489_v57 = vmax.f32 %v367_v17, %v457_v20 }
 0x164   :  { %v1521_v24 = vpop.f32.mrb[29].mxu0 }
 0x165   :  { %v490_v25 = vmax.f32 %v370_v21, %v458_v22  ;;  %v1522_v26 = vadd.f32 %v1521_v24, %v1520_v23  ;;  %v1523_v27 = vpop.f32.mrb[30].mxu0 }
 0x166   :  { %v1524_v28 = vpop.f32.mrb[31].mxu0 }
 0x167   :  { %v375_v29 = vadd.f32 %v1522_v26, %v2026_v62  ;;  %v1525_v30 = vadd.f32 %v1524_v28, %v1523_v27  ;;  %v515_v32 = vpack.c.bf16 %v490_v25, %v489_v57 }
 0x169   :  { %v459_v33 = vmul.f32 0.2, %v375_v29  ;;  %v378_v34 = vadd.f32 %v1525_v30, %v2026_v62  ;;  %1674 = vmatprep.mubr.bf16.mxu1 %v515_v32 }
 0x16b   :  { %v460_v35 = vmul.f32 0.2, %v378_v34  ;;  %v1526_v36 = vpop.f32.mrb[32].mxu0  ;;  %v491_v39 = vmax.f32 %v375_v29, %v459_v33 }
 0x16c   :  { %v1527_v38 = vpop.f32.mrb[33].mxu0 }
 0x16d   :  { %v492_v40 = vmax.f32 %v378_v34, %v460_v35  ;;  %v1528_v41 = vadd.f32 %v1527_v38, %v1526_v36  ;;  %v1529_v42 = vpop.f32.mrb[34].mxu0  ;;  %v1845_v34 = vld [vmem:[#allocation5 + $0xe8] sm:$0xff]   ;;  %v1846_v35 = vld [vmem:[#allocation5 + $0xf0] sm:$0xff]   ;;  %v1847_v36 = vld [vmem:[#allocation5 + $0xf8] sm:$0xff]  }
 0x16e   :  { %v1530_v43 = vpop.f32.mrb[35].mxu0  ;;  %1704 = vmatprep.subr.bf16.mxu1 %v1845_v34  ;;  %v1849_v38 = vld [vmem:[#allocation5 + $0x108] sm:$0xff]  }
 0x16f   :  { %v383_v44 = vadd.f32 %v1528_v41, %v2026_v62  ;;  %v1531_v45 = vadd.f32 %v1530_v43, %v1529_v42  ;;  %v516_v46 = vpack.c.bf16 %v492_v40, %v491_v39  ;;  %1705 = vmatpush3.bf16.msra.mxu1 %v1845_v34  ;;  %v1851_v39 = vld [vmem:[#allocation5 + $0x118] sm:$0xff]  }
 0x170   :  { %1706 = vmatprep.subr.bf16.mxu1 %v1846_v35 }
 0x171   :  { %v461_v47 = vmul.f32 0.2, %v383_v44  ;;  %v386_v48 = vadd.f32 %v1531_v45, %v2026_v62  ;;  %1675 = vmatmul.mubr.bf16.gmra.mrb[28].mxu1 %v516_v46 }
 0x173   :  { %v462_v49 = vmul.f32 0.2, %v386_v48  ;;  %v1532_v50 = vpop.f32.mrb[36].mxu0  ;;  %v493_v53 = vmax.f32 %v383_v44, %v461_v47  ;;  %1707 = vmatpush3.bf16.msra.mxu1 %v1846_v35 }
 0x174   :  { %v1533_v51 = vpop.f32.mrb[37].mxu0  ;;  %1708 = vmatprep.subr.bf16.mxu1 %v1847_v36 }
 0x175   :  { %v494_v54 = vmax.f32 %v386_v48, %v462_v49  ;;  %v1534_v55 = vadd.f32 %v1533_v51, %v1532_v50  ;;  %v1535_v56 = vpop.f32.mrb[38].mxu0 }
 0x176   :  { %v1536_v59 = vpop.f32.mrb[39].mxu0 }
 0x177   :  { %v391_v61 = vadd.f32 %v1534_v55, %v2026_v62  ;;  %v1537_v63 = vadd.f32 %v1536_v59, %v1535_v56  ;;  %v517_v0 = vpack.c.bf16 %v494_v54, %v493_v53  ;;  %1709 = vmatpush3.bf16.msra.mxu1 %v1847_v36 }
 0x179   :  { %v463_v1 = vmul.f32 0.2, %v391_v61  ;;  %v394_v2 = vadd.f32 %v1537_v63, %v2026_v62  ;;  %1678 = vmatprep.mubr.bf16.mxu1 %v517_v0 }
 0x17b   :  { %v464_v3 = vmul.f32 0.2, %v394_v2  ;;  %v1538_v5 = vpop.f32.mrb[40].mxu0  ;;  %v495_v7 = vmax.f32 %v391_v61, %v463_v1 }
 0x17c   :  { %v1539_v6 = vpop.f32.mrb[41].mxu0 }
 0x17d   :  { %v496_v8 = vmax.f32 %v394_v2, %v464_v3  ;;  %v1540_v9 = vadd.f32 %v1539_v6, %v1538_v5  ;;  %v1541_v10 = vpop.f32.mrb[42].mxu0 }
 0x17e   :  { %v1542_v11 = vpop.f32.mrb[43].mxu0 }
 0x17f   :  { %v399_v12 = vadd.f32 %v1540_v9, %v2026_v62  ;;  %v1543_v13 = vadd.f32 %v1542_v11, %v1541_v10  ;;  %v518_v14 = vpack.c.bf16 %v496_v8, %v495_v7 }
 0x181   :  { %v465_v15 = vmul.f32 0.2, %v399_v12  ;;  %v402_v16 = vadd.f32 %v1543_v13, %v2026_v62  ;;  %1679 = vmatmul.mubr.bf16.gmra.mrb[32].mxu1 %v518_v14 }
 0x183   :  { %v466_v17 = vmul.f32 0.2, %v402_v16  ;;  %v1544_v18 = vpop.f32.mrb[44].mxu0  ;;  %v497_v20 = vmax.f32 %v399_v12, %v465_v15 }
 0x184   :  { %v1545_v19 = vpop.f32.mrb[45].mxu0 }
 0x185   :  { %v498_v21 = vmax.f32 %v402_v16, %v466_v17  ;;  %v1546_v22 = vadd.f32 %v1545_v19, %v1544_v18  ;;  %v1547_v23 = vpop.f32.mrb[46].mxu0 }
 0x186   :  { %v1548_v24 = vpop.f32.mrb[47].mxu0 }
 0x187   :  { %v407_v57 = vadd.f32 %v1546_v22, %v2026_v62  ;;  %v1549_v25 = vadd.f32 %v1548_v24, %v1547_v23  ;;  %v519_v26 = vpack.c.bf16 %v498_v21, %v497_v20 }
 0x189   :  { %v467_v27 = vmul.f32 0.2, %v407_v57  ;;  %v410_v28 = vadd.f32 %v1549_v25, %v2026_v62  ;;  %1682 = vmatprep.mubr.bf16.mxu1 %v519_v26  ;;  %v1848_v62 = vld [vmem:[#allocation5 + $0x100] sm:$0xff]  }
 0x18a   :  { %1742 = vmatprep.subr.bf16.mxu0 %v1848_v62 }
 0x18b   :  { %v468_v29 = vmul.f32 0.2, %v410_v28  ;;  %v499_v30 = vmax.f32 %v407_v57, %v467_v27  ;;  %1743 = vmatpush3.bf16.msra.mxu0 %v1848_v62 }
 0x18c   :  { %1744 = vmatprep.subr.bf16.mxu0 %v1849_v38 }
 0x18d   :  { %v500_v32 = vmax.f32 %v410_v28, %v468_v29 }
 0x18f   :  { %v520_v33 = vpack.c.bf16 %v500_v32, %v499_v30  ;;  %1745 = vmatpush3.bf16.msra.mxu0 %v1849_v38 }
 0x191   :  { %1683 = vmatmul.mubr.bf16.gmra.mrb[36].mxu1 %v520_v33 }
 0x192   :  { %1686 = vmatprep.mubr.bf16.mxu1 %v2034_v37  ;;  %v1850_v37 = vld [vmem:[#allocation5 + $0x110] sm:$0xff]  }
 0x193   :  { %1746 = vmatprep.subr.bf16.mxu0 %v1850_v37 }
 0x194   :  { %1747 = vmatpush3.bf16.msra.mxu0 %v1850_v37 }
 0x195   :  { %1748 = vmatprep.subr.bf16.mxu0 %v1851_v39 }
 0x198   :  { %1749 = vmatpush3.bf16.msra.mxu0 %v1851_v39 }
 0x199   :  { %1687 = vmatmul.mubr.bf16.gmra.mrb[40].mxu1 %v2040_v4  ;;  %v543_v4 = vsub.s32 1, %v2019_v58 }
 0x19a   :  { %1690 = vmatprep.mubr.bf16.mxu1 %v2047_v31  ;;  %v1852_v31 = vld [vmem:[#allocation5 + $0x120] sm:$0xff]  }
 0x19b   :  { %v2075_v40 = vrot.slane %v2023_v60, %v543_v4  ;;  %1750 = vmatprep.subr.bf16.mxu0 %v1852_v31 }
 0x19c   :  { %1751 = vmatpush3.bf16.msra.mxu0 %v1852_v31 }
 0x1a1   :  { %1691 = vmatmul.mubr.bf16.gmra.mrb[44].mxu1 %v2052_v52 }
 0x214   :  { %v1664_v52 = vpop.f32.mrb[16].mxu1 }
 0x215   :  { %v636_v41 = vadd.f32 %v1664_v52, %v2075_v40  ;;  %v627_v42 = vpop.f32.mrb[17].mxu1 }
 0x216   :  { %v628_v43 = vadd.f32 %v627_v42, %v2075_v40  ;;  %v1665_v44 = vpop.f32.mrb[18].mxu1 }
 0x217   :  { %v756_v45 = vmul.f32 0.2, %v636_v41  ;;  %v639_v46 = vadd.f32 %v1665_v44, %v2075_v40  ;;  %v630_v47 = vpop.f32.mrb[19].mxu1 }
 0x218   :  { %v754_v48 = vmul.f32 0.2, %v628_v43  ;;  %v631_v49 = vadd.f32 %v630_v47, %v2075_v40 }
 0x219   :  { %v757_v50 = vmul.f32 0.2, %v639_v46  ;;  %v788_v53 = vmax.f32 %v636_v41, %v756_v45 }
 0x21a   :  { %v755_v51 = vmul.f32 0.2, %v631_v49  ;;  %v786_v55 = vmax.f32 %v628_v43, %v754_v48 }
 0x21b   :  { %v789_v54 = vmax.f32 %v639_v46, %v757_v50 }
 0x21c   :  { %v787_v56 = vmax.f32 %v631_v49, %v755_v51 }
 0x21d   :  { %v819_v59 = vpack.c.bf16 %v789_v54, %v788_v53 }
 0x21e   :  { %v818_v61 = vpack.c.bf16 %v787_v56, %v786_v55 }
 0x220   :  { %1710 = vmatprep.mubr.bf16.mxu1 %v818_v61 }
 0x221   :  { %1711 = vmatmul.mubr.bf16.vlgmr.msra.gmra.mrb[48].mxu1 %v819_v59 }
 0x224   :  { %v1668_v63 = vpop.f32.mrb[20].mxu1 }
 0x225   :  { %v652_v0 = vadd.f32 %v1668_v63, %v2075_v40  ;;  %v643_v1 = vpop.f32.mrb[21].mxu1 }
 0x226   :  { %v644_v2 = vadd.f32 %v643_v1, %v2075_v40  ;;  %v1669_v3 = vpop.f32.mrb[22].mxu1 }
 0x227   :  { %v760_v5 = vmul.f32 0.2, %v652_v0  ;;  %v655_v6 = vadd.f32 %v1669_v3, %v2075_v40  ;;  %v646_v7 = vpop.f32.mrb[23].mxu1 }
 0x228   :  { %v758_v8 = vmul.f32 0.2, %v644_v2  ;;  %v647_v9 = vadd.f32 %v646_v7, %v2075_v40 }
 0x229   :  { %v761_v10 = vmul.f32 0.2, %v655_v6  ;;  %v792_v12 = vmax.f32 %v652_v0, %v760_v5 }
 0x22a   :  { %v759_v11 = vmul.f32 0.2, %v647_v9  ;;  %v790_v14 = vmax.f32 %v644_v2, %v758_v8 }
 0x22b   :  { %v793_v13 = vmax.f32 %v655_v6, %v761_v10 }
 0x22c   :  { %v791_v15 = vmax.f32 %v647_v9, %v759_v11 }
 0x22d   :  { %v821_v16 = vpack.c.bf16 %v793_v13, %v792_v12 }
 0x22e   :  { %v820_v17 = vpack.c.bf16 %v791_v15, %v790_v14 }
 0x230   :  { %1714 = vmatprep.mubr.bf16.mxu1 %v820_v17 }
 0x231   :  { %1715 = vmatmul.mubr.bf16.gmra.mrb[52].mxu1 %v821_v16 }
 0x234   :  { %v1672_v18 = vpop.f32.mrb[24].mxu1 }
 0x235   :  { %v668_v19 = vadd.f32 %v1672_v18, %v2075_v40  ;;  %v659_v20 = vpop.f32.mrb[25].mxu1 }
 0x236   :  { %v660_v21 = vadd.f32 %v659_v20, %v2075_v40  ;;  %v1673_v22 = vpop.f32.mrb[26].mxu1 }
 0x237   :  { %v764_v23 = vmul.f32 0.2, %v668_v19  ;;  %v671_v24 = vadd.f32 %v1673_v22, %v2075_v40  ;;  %v662_v57 = vpop.f32.mrb[27].mxu1 }
 0x238   :  { %v762_v25 = vmul.f32 0.2, %v660_v21  ;;  %v663_v26 = vadd.f32 %v662_v57, %v2075_v40 }
 0x239   :  { %v765_v27 = vmul.f32 0.2, %v671_v24  ;;  %v796_v29 = vmax.f32 %v668_v19, %v764_v23 }
 0x23a   :  { %v763_v28 = vmul.f32 0.2, %v663_v26  ;;  %v794_v32 = vmax.f32 %v660_v21, %v762_v25 }
 0x23b   :  { %v797_v30 = vmax.f32 %v671_v24, %v765_v27 }
 0x23c   :  { %v795_v33 = vmax.f32 %v663_v26, %v763_v28 }
 0x23d   :  { %v823_v34 = vpack.c.bf16 %v797_v30, %v796_v29 }
 0x23e   :  { %v822_v35 = vpack.c.bf16 %v795_v33, %v794_v32 }
 0x240   :  { %1718 = vmatprep.mubr.bf16.mxu1 %v822_v35 }
 0x241   :  { %1719 = vmatmul.mubr.bf16.gmra.mrb[56].mxu1 %v823_v34 }
 0x244   :  { %v1676_v36 = vpop.f32.mrb[28].mxu1 }
 0x245   :  { %v684_v62 = vadd.f32 %v1676_v36, %v2075_v40  ;;  %v675_v38 = vpop.f32.mrb[29].mxu1 }
 0x246   :  { %v676_v37 = vadd.f32 %v675_v38, %v2075_v40  ;;  %v1677_v39 = vpop.f32.mrb[30].mxu1 }
 0x247   :  { %v768_v4 = vmul.f32 0.2, %v684_v62  ;;  %v687_v31 = vadd.f32 %v1677_v39, %v2075_v40  ;;  %v678_v52 = vpop.f32.mrb[31].mxu1 }
 0x248   :  { %v766_v41 = vmul.f32 0.2, %v676_v37  ;;  %v679_v42 = vadd.f32 %v678_v52, %v2075_v40  ;;  %v1853_v52 = vld [vmem:[#allocation5 + $0x128] sm:$0xff]  }
 0x249   :  { %v769_v43 = vmul.f32 0.2, %v687_v31  ;;  %v800_v45 = vmax.f32 %v684_v62, %v768_v4  ;;  %1752 = vmatprep.subr.bf16.mxu0 %v1853_v52 }
 0x24a   :  { %v767_v44 = vmul.f32 0.2, %v679_v42  ;;  %v798_v47 = vmax.f32 %v676_v37, %v766_v41  ;;  %1753 = vmatpush3.bf16.msra.mxu0 %v1853_v52 }
 0x24b   :  { %v801_v46 = vmax.f32 %v687_v31, %v769_v43 }
 0x24c   :  { %v799_v48 = vmax.f32 %v679_v42, %v767_v44 }
 0x24d   :  { %v825_v49 = vpack.c.bf16 %v801_v46, %v800_v45 }
 0x24e   :  { %v824_v50 = vpack.c.bf16 %v799_v48, %v798_v47 }
 0x250   :  { %1722 = vmatprep.mubr.bf16.mxu1 %v824_v50 }
 0x251   :  { %1723 = vmatmul.mubr.bf16.gmra.mrb[60].mxu1 %v825_v49 }
 0x254   :  { %v1680_v51 = vpop.f32.mrb[32].mxu1 }
 0x255   :  { %v700_v53 = vadd.f32 %v1680_v51, %v2075_v40  ;;  %v691_v54 = vpop.f32.mrb[33].mxu1 }
 0x256   :  { %v692_v55 = vadd.f32 %v691_v54, %v2075_v40  ;;  %v1681_v56 = vpop.f32.mrb[34].mxu1  ;;  %v1854_v54 = vld [vmem:[#allocation5 + $0x130] sm:$0xff]  }
 0x257   :  { %v772_v59 = vmul.f32 0.2, %v700_v53  ;;  %v703_v61 = vadd.f32 %v1681_v56, %v2075_v40  ;;  %v694_v63 = vpop.f32.mrb[35].mxu1  ;;  %1754 = vmatprep.subr.bf16.mxu0 %v1854_v54 }
 0x258   :  { %v770_v0 = vmul.f32 0.2, %v692_v55  ;;  %v695_v1 = vadd.f32 %v694_v63, %v2075_v40  ;;  %1755 = vmatpush3.bf16.msra.mxu0 %v1854_v54 }
 0x259   :  { %v773_v2 = vmul.f32 0.2, %v703_v61  ;;  %v804_v5 = vmax.f32 %v700_v53, %v772_v59 }
 0x25a   :  { %v771_v3 = vmul.f32 0.2, %v695_v1  ;;  %v802_v7 = vmax.f32 %v692_v55, %v770_v0 }
 0x25b   :  { %v805_v6 = vmax.f32 %v703_v61, %v773_v2 }
 0x25c   :  { %v803_v8 = vmax.f32 %v695_v1, %v771_v3  ;;  %v1855_v1 = vld [vmem:[#allocation5 + $0x138] sm:$0xff]  }
 0x25d   :  { %v827_v9 = vpack.c.bf16 %v805_v6, %v804_v5  ;;  %1756 = vmatprep.subr.bf16.mxu0 %v1855_v1 }
 0x25e   :  { %v826_v10 = vpack.c.bf16 %v803_v8, %v802_v7  ;;  %1757 = vmatpush3.bf16.msra.mxu0 %v1855_v1  ;;  %v852_v7 = vsub.s32 2, %v2019_v58 }
 0x260   :  { %1726 = vmatprep.mubr.bf16.mxu1 %v826_v10 }
 0x261   :  { %1727 = vmatmul.mubr.bf16.gmra.mrb[64].mxu1 %v827_v9 }
 0x264   :  { %v1684_v11 = vpop.f32.mrb[36].mxu1 }
 0x265   :  { %v716_v12 = vadd.f32 %v1684_v11, %v2075_v40  ;;  %v707_v13 = vpop.f32.mrb[37].mxu1 }
 0x266   :  { %v708_v14 = vadd.f32 %v707_v13, %v2075_v40  ;;  %v1685_v15 = vpop.f32.mrb[38].mxu1 }
 0x267   :  { %v776_v16 = vmul.f32 0.2, %v716_v12  ;;  %v719_v17 = vadd.f32 %v1685_v15, %v2075_v40  ;;  %v710_v18 = vpop.f32.mrb[39].mxu1 }
 0x268   :  { %v774_v19 = vmul.f32 0.2, %v708_v14  ;;  %v711_v20 = vadd.f32 %v710_v18, %v2075_v40 }
 0x269   :  { %v777_v21 = vmul.f32 0.2, %v719_v17  ;;  %v808_v23 = vmax.f32 %v716_v12, %v776_v16 }
 0x26a   :  { %v775_v22 = vmul.f32 0.2, %v711_v20  ;;  %v806_v57 = vmax.f32 %v708_v14, %v774_v19 }
 0x26b   :  { %v809_v24 = vmax.f32 %v719_v17, %v777_v21 }
 0x26c   :  { %v807_v25 = vmax.f32 %v711_v20, %v775_v22  ;;  %v1688_v26 = vpop.f32.mrb[40].mxu1 }
 0x26d   :  { %v732_v27 = vadd.f32 %v1688_v26, %v2075_v40  ;;  %v723_v28 = vpop.f32.mrb[41].mxu1  ;;  %v829_v29 = vpack.c.bf16 %v809_v24, %v808_v23 }
 0x26e   :  { %v724_v30 = vadd.f32 %v723_v28, %v2075_v40  ;;  %v1689_v32 = vpop.f32.mrb[42].mxu1  ;;  %v828_v33 = vpack.c.bf16 %v807_v25, %v806_v57 }
 0x26f   :  { %v780_v34 = vmul.f32 0.2, %v732_v27  ;;  %v735_v35 = vadd.f32 %v1689_v32, %v2075_v40  ;;  %v726_v36 = vpop.f32.mrb[43].mxu1 }
 0x270   :  { %v778_v62 = vmul.f32 0.2, %v724_v30  ;;  %v727_v38 = vadd.f32 %v726_v36, %v2075_v40  ;;  %1730 = vmatprep.mubr.bf16.mxu1 %v828_v33 }
 0x271   :  { %v781_v37 = vmul.f32 0.2, %v735_v35  ;;  %1731 = vmatmul.mubr.bf16.gmra.mrb[68].mxu1 %v829_v29  ;;  %v812_v4 = vmax.f32 %v732_v27, %v780_v34 }
 0x272   :  { %v779_v39 = vmul.f32 0.2, %v727_v38  ;;  %v810_v41 = vmax.f32 %v724_v30, %v778_v62 }
 0x273   :  { %v813_v31 = vmax.f32 %v735_v35, %v781_v37 }
 0x274   :  { %v811_v42 = vmax.f32 %v727_v38, %v779_v39  ;;  %v1692_v43 = vpop.f32.mrb[44].mxu1 }
 0x275   :  { %v748_v44 = vadd.f32 %v1692_v43, %v2075_v40  ;;  %v739_v45 = vpop.f32.mrb[45].mxu1  ;;  %v831_v46 = vpack.c.bf16 %v813_v31, %v812_v4 }
 0x276   :  { %v740_v47 = vadd.f32 %v739_v45, %v2075_v40  ;;  %v1693_v48 = vpop.f32.mrb[46].mxu1  ;;  %v830_v49 = vpack.c.bf16 %v811_v42, %v810_v41 }
 0x277   :  { %v784_v50 = vmul.f32 0.2, %v748_v44  ;;  %v751_v51 = vadd.f32 %v1693_v48, %v2075_v40  ;;  %v742_v53 = vpop.f32.mrb[47].mxu1 }
 0x278   :  { %v782_v55 = vmul.f32 0.2, %v740_v47  ;;  %v743_v56 = vadd.f32 %v742_v53, %v2075_v40  ;;  %1734 = vmatprep.mubr.bf16.mxu1 %v830_v49  ;;  %v2111_v40 = vrot.slane %v2023_v60, %v852_v7 }
 0x279   :  { %v785_v59 = vmul.f32 0.2, %v751_v51  ;;  %1735 = vmatmul.mubr.bf16.gmra.mrb[72].mxu1 %v831_v46  ;;  %v816_v63 = vmax.f32 %v748_v44, %v784_v50 }
 0x27a   :  { %v783_v61 = vmul.f32 0.2, %v743_v56  ;;  %v814_v2 = vmax.f32 %v740_v47, %v782_v55 }
 0x27b   :  { %v817_v0 = vmax.f32 %v751_v51, %v785_v59 }
 0x27c   :  { %v815_v3 = vmax.f32 %v743_v56, %v783_v61 }
 0x27d   :  { %v833_v5 = vpack.c.bf16 %v817_v0, %v816_v63 }
 0x27e   :  { %v832_v6 = vpack.c.bf16 %v815_v3, %v814_v2 }
 0x280   :  { %1738 = vmatprep.mubr.bf16.mxu1 %v832_v6 }
 0x281   :  { %1739 = vmatmul.mubr.bf16.gmra.mrb[76].mxu1 %v833_v5 }
 0x2f4   :  { %v1712_v8 = vpop.f32.mrb[48].mxu1 }
 0x2f5   :  { %v945_v9 = vadd.f32 %v1712_v8, %v2111_v40  ;;  %v936_v10 = vpop.f32.mrb[49].mxu1 }
 0x2f6   :  { %v937_v11 = vadd.f32 %v936_v10, %v2111_v40  ;;  %v1713_v12 = vpop.f32.mrb[50].mxu1 }
 0x2f7   :  { %v1065_v13 = vmul.f32 0.2, %v945_v9  ;;  %v948_v14 = vadd.f32 %v1713_v12, %v2111_v40  ;;  %v939_v15 = vpop.f32.mrb[51].mxu1 }
 0x2f8   :  { %v1063_v16 = vmul.f32 0.2, %v937_v11  ;;  %v940_v17 = vadd.f32 %v939_v15, %v2111_v40 }
 0x2f9   :  { %v1066_v18 = vmul.f32 0.2, %v948_v14  ;;  %v1097_v20 = vmax.f32 %v945_v9, %v1065_v13 }
 0x2fa   :  { %v1064_v19 = vmul.f32 0.2, %v940_v17  ;;  %v1095_v60 = vmax.f32 %v937_v11, %v1063_v16 }
 0x2fb   :  { %v1098_v21 = vmax.f32 %v948_v14, %v1066_v18 }
 0x2fc   :  { %v1096_v22 = vmax.f32 %v940_v17, %v1064_v19 }
 0x2fd   :  { %v1128_v23 = vpack.c.bf16 %v1098_v21, %v1097_v20 }
 0x2fe   :  { %v1127_v24 = vpack.c.bf16 %v1096_v22, %v1095_v60 }
 0x300   :  { %1758 = vmatprep.mubr.bf16.mxu0 %v1127_v24 }
 0x301   :  { %1759 = vmatmul.mubr.bf16.vlgmr.msra.gmra.mrb[48].mxu0 %v1128_v23 }
 0x304   :  { %v1716_v57 = vpop.f32.mrb[52].mxu1 }
 0x305   :  { %v961_v25 = vadd.f32 %v1716_v57, %v2111_v40  ;;  %v952_v26 = vpop.f32.mrb[53].mxu1 }
 0x306   :  { %v953_v27 = vadd.f32 %v952_v26, %v2111_v40  ;;  %v1717_v28 = vpop.f32.mrb[54].mxu1 }
 0x307   :  { %v1069_v29 = vmul.f32 0.2, %v961_v25  ;;  %v964_v30 = vadd.f32 %v1717_v28, %v2111_v40  ;;  %v955_v32 = vpop.f32.mrb[55].mxu1 }
 0x308   :  { %v1067_v33 = vmul.f32 0.2, %v953_v27  ;;  %v956_v34 = vadd.f32 %v955_v32, %v2111_v40 }
 0x309   :  { %v1070_v35 = vmul.f32 0.2, %v964_v30  ;;  %v1101_v62 = vmax.f32 %v961_v25, %v1069_v29 }
 0x30a   :  { %v1068_v36 = vmul.f32 0.2, %v956_v34  ;;  %v1099_v37 = vmax.f32 %v953_v27, %v1067_v33 }
 0x30b   :  { %v1102_v38 = vmax.f32 %v964_v30, %v1070_v35 }
 0x30c   :  { %v1100_v39 = vmax.f32 %v956_v34, %v1068_v36 }
 0x30d   :  { %v1130_v4 = vpack.c.bf16 %v1102_v38, %v1101_v62 }
 0x30e   :  { %v1129_v31 = vpack.c.bf16 %v1100_v39, %v1099_v37 }
 0x310   :  { %1762 = vmatprep.mubr.bf16.mxu0 %v1129_v31 }
 0x311   :  { %1763 = vmatmul.mubr.bf16.gmra.mrb[52].mxu0 %v1130_v4 }
 0x314   :  { %v1720_v52 = vpop.f32.mrb[56].mxu1 }
 0x315   :  { %v977_v41 = vadd.f32 %v1720_v52, %v2111_v40  ;;  %v968_v42 = vpop.f32.mrb[57].mxu1 }
 0x316   :  { %v969_v43 = vadd.f32 %v968_v42, %v2111_v40  ;;  %v1721_v44 = vpop.f32.mrb[58].mxu1 }
 0x317   :  { %v1073_v45 = vmul.f32 0.2, %v977_v41  ;;  %v980_v46 = vadd.f32 %v1721_v44, %v2111_v40  ;;  %v971_v47 = vpop.f32.mrb[59].mxu1 }
 0x318   :  { %v1071_v48 = vmul.f32 0.2, %v969_v43  ;;  %v972_v49 = vadd.f32 %v971_v47, %v2111_v40 }
 0x319   :  { %v1074_v50 = vmul.f32 0.2, %v980_v46  ;;  %v1105_v53 = vmax.f32 %v977_v41, %v1073_v45 }
 0x31a   :  { %v1072_v51 = vmul.f32 0.2, %v972_v49  ;;  %v1103_v55 = vmax.f32 %v969_v43, %v1071_v48 }
 0x31b   :  { %v1106_v54 = vmax.f32 %v980_v46, %v1074_v50 }
 0x31c   :  { %v1104_v56 = vmax.f32 %v972_v49, %v1072_v51 }
 0x31d   :  { %v1132_v59 = vpack.c.bf16 %v1106_v54, %v1105_v53 }
 0x31e   :  { %v1131_v61 = vpack.c.bf16 %v1104_v56, %v1103_v55 }
 0x320   :  { %1766 = vmatprep.mubr.bf16.mxu0 %v1131_v61 }
 0x321   :  { %1767 = vmatmul.mubr.bf16.gmra.mrb[56].mxu0 %v1132_v59 }
 0x324   :  { %v1724_v63 = vpop.f32.mrb[60].mxu1 }
 0x325   :  { %v993_v0 = vadd.f32 %v1724_v63, %v2111_v40  ;;  %v984_v1 = vpop.f32.mrb[61].mxu1 }
 0x326   :  { %v985_v2 = vadd.f32 %v984_v1, %v2111_v40  ;;  %v1725_v3 = vpop.f32.mrb[62].mxu1 }
 0x327   :  { %v1077_v5 = vmul.f32 0.2, %v993_v0  ;;  %v996_v6 = vadd.f32 %v1725_v3, %v2111_v40  ;;  %v987_v7 = vpop.f32.mrb[63].mxu1 }
 0x328   :  { %v1075_v8 = vmul.f32 0.2, %v985_v2  ;;  %v988_v9 = vadd.f32 %v987_v7, %v2111_v40 }
 0x329   :  { %v1078_v10 = vmul.f32 0.2, %v996_v6  ;;  %v1109_v12 = vmax.f32 %v993_v0, %v1077_v5 }
 0x32a   :  { %v1076_v11 = vmul.f32 0.2, %v988_v9  ;;  %v1107_v14 = vmax.f32 %v985_v2, %v1075_v8 }
 0x32b   :  { %v1110_v13 = vmax.f32 %v996_v6, %v1078_v10 }
 0x32c   :  { %v1108_v15 = vmax.f32 %v988_v9, %v1076_v11 }
 0x32d   :  { %v1134_v16 = vpack.c.bf16 %v1110_v13, %v1109_v12 }
 0x32e   :  { %v1133_v17 = vpack.c.bf16 %v1108_v15, %v1107_v14 }
 0x330   :  { %1770 = vmatprep.mubr.bf16.mxu0 %v1133_v17 }
 0x331   :  { %1771 = vmatmul.mubr.bf16.gmra.mrb[60].mxu0 %v1134_v16 }
 0x334   :  { %v1728_v18 = vpop.f32.mrb[64].mxu1 }
 0x335   :  { %v1009_v19 = vadd.f32 %v1728_v18, %v2111_v40  ;;  %v1000_v20 = vpop.f32.mrb[65].mxu1 }
 0x336   :  { %v1001_v21 = vadd.f32 %v1000_v20, %v2111_v40  ;;  %v1729_v60 = vpop.f32.mrb[66].mxu1 }
 0x337   :  { %v1081_v22 = vmul.f32 0.2, %v1009_v19  ;;  %v1012_v23 = vadd.f32 %v1729_v60, %v2111_v40  ;;  %v1003_v24 = vpop.f32.mrb[67].mxu1 }
 0x338   :  { %v1079_v57 = vmul.f32 0.2, %v1001_v21  ;;  %v1004_v25 = vadd.f32 %v1003_v24, %v2111_v40 }
 0x339   :  { %v1082_v26 = vmul.f32 0.2, %v1012_v23  ;;  %v1113_v28 = vmax.f32 %v1009_v19, %v1081_v22 }
 0x33a   :  { %v1080_v27 = vmul.f32 0.2, %v1004_v25  ;;  %v1111_v30 = vmax.f32 %v1001_v21, %v1079_v57 }
 0x33b   :  { %v1114_v29 = vmax.f32 %v1012_v23, %v1082_v26  ;;  %v1161_v26 = vsub.s32 3, %v2019_v58 }
 0x33c   :  { %v1112_v32 = vmax.f32 %v1004_v25, %v1080_v27  ;;  %v1856_v27 = vld [vmem:[#allocation7] sm:$0xff] }
 0x33d   :  { %v1136_v33 = vpack.c.bf16 %v1114_v29, %v1113_v28  ;;  %v2146_v28 = vrot.slane %v1856_v27, %v1161_v26 }
 0x33e   :  { %v1135_v34 = vpack.c.bf16 %v1112_v32, %v1111_v30 }
 0x340   :  { %1774 = vmatprep.mubr.bf16.mxu0 %v1135_v34 }
 0x341   :  { %1775 = vmatmul.mubr.bf16.gmra.mrb[64].mxu0 %v1136_v33 }
 0x344   :  { %v1732_v35 = vpop.f32.mrb[68].mxu1 }
 0x345   :  { %v1025_v36 = vadd.f32 %v1732_v35, %v2111_v40  ;;  %v1016_v62 = vpop.f32.mrb[69].mxu1 }
 0x346   :  { %v1017_v38 = vadd.f32 %v1016_v62, %v2111_v40  ;;  %v1733_v37 = vpop.f32.mrb[70].mxu1 }
 0x347   :  { %v1085_v39 = vmul.f32 0.2, %v1025_v36  ;;  %v1028_v4 = vadd.f32 %v1733_v37, %v2111_v40  ;;  %v1019_v31 = vpop.f32.mrb[71].mxu1 }
 0x348   :  { %v1083_v52 = vmul.f32 0.2, %v1017_v38  ;;  %v1020_v41 = vadd.f32 %v1019_v31, %v2111_v40 }
 0x349   :  { %v1086_v42 = vmul.f32 0.2, %v1028_v4  ;;  %v1117_v44 = vmax.f32 %v1025_v36, %v1085_v39 }
 0x34a   :  { %v1084_v43 = vmul.f32 0.2, %v1020_v41  ;;  %v1115_v46 = vmax.f32 %v1017_v38, %v1083_v52 }
 0x34b   :  { %v1118_v45 = vmax.f32 %v1028_v4, %v1086_v42 }
 0x34c   :  { %v1116_v47 = vmax.f32 %v1020_v41, %v1084_v43  ;;  %v1736_v48 = vpop.f32.mrb[72].mxu1 }
 0x34d   :  { %v1041_v49 = vadd.f32 %v1736_v48, %v2111_v40  ;;  %v1032_v50 = vpop.f32.mrb[73].mxu1  ;;  %v1138_v51 = vpack.c.bf16 %v1118_v45, %v1117_v44 }
 0x34e   :  { %v1033_v53 = vadd.f32 %v1032_v50, %v2111_v40  ;;  %v1737_v54 = vpop.f32.mrb[74].mxu1  ;;  %v1137_v55 = vpack.c.bf16 %v1116_v47, %v1115_v46 }
 0x34f   :  { %v1089_v56 = vmul.f32 0.2, %v1041_v49  ;;  %v1044_v59 = vadd.f32 %v1737_v54, %v2111_v40  ;;  %v1035_v61 = vpop.f32.mrb[75].mxu1 }
 0x350   :  { %v1087_v63 = vmul.f32 0.2, %v1033_v53  ;;  %v1036_v0 = vadd.f32 %v1035_v61, %v2111_v40  ;;  %1778 = vmatprep.mubr.bf16.mxu0 %v1137_v55 }
 0x351   :  { %v1090_v1 = vmul.f32 0.2, %v1044_v59  ;;  %1779 = vmatmul.mubr.bf16.gmra.mrb[68].mxu0 %v1138_v51  ;;  %v1121_v3 = vmax.f32 %v1041_v49, %v1089_v56 }
 0x352   :  { %v1088_v2 = vmul.f32 0.2, %v1036_v0  ;;  %v1119_v6 = vmax.f32 %v1033_v53, %v1087_v63 }
 0x353   :  { %v1122_v5 = vmax.f32 %v1044_v59, %v1090_v1 }
 0x354   :  { %v1120_v7 = vmax.f32 %v1036_v0, %v1088_v2  ;;  %v1740_v8 = vpop.f32.mrb[76].mxu1 }
 0x355   :  { %v1057_v9 = vadd.f32 %v1740_v8, %v2111_v40  ;;  %v1048_v10 = vpop.f32.mrb[77].mxu1  ;;  %v1140_v11 = vpack.c.bf16 %v1122_v5, %v1121_v3 }
 0x356   :  { %v1049_v12 = vadd.f32 %v1048_v10, %v2111_v40  ;;  %v1741_v13 = vpop.f32.mrb[78].mxu1  ;;  %v1139_v14 = vpack.c.bf16 %v1120_v7, %v1119_v6 }
 0x357   :  { %v1093_v15 = vmul.f32 0.2, %v1057_v9  ;;  %v1060_v16 = vadd.f32 %v1741_v13, %v2111_v40  ;;  %v1051_v17 = vpop.f32.mrb[79].mxu1 }
 0x358   :  { %v1091_v18 = vmul.f32 0.2, %v1049_v12  ;;  %v1052_v19 = vadd.f32 %v1051_v17, %v2111_v40  ;;  %1782 = vmatprep.mubr.bf16.mxu0 %v1139_v14 }
 0x359   :  { %v1094_v20 = vmul.f32 0.2, %v1060_v16  ;;  %1783 = vmatmul.mubr.bf16.gmra.mrb[72].mxu0 %v1140_v11  ;;  %v1125_v60 = vmax.f32 %v1057_v9, %v1093_v15 }
 0x35a   :  { %v1092_v21 = vmul.f32 0.2, %v1052_v19  ;;  %v1123_v23 = vmax.f32 %v1049_v12, %v1091_v18 }
 0x35b   :  { %v1126_v22 = vmax.f32 %v1060_v16, %v1094_v20 }
 0x35c   :  { %v1124_v24 = vmax.f32 %v1052_v19, %v1092_v21 }
 0x35d   :  { %v1142_v57 = vpack.c.bf16 %v1126_v22, %v1125_v60 }
 0x35e   :  { %v1141_v25 = vpack.c.bf16 %v1124_v24, %v1123_v23 }
 0x360   :  { %1786 = vmatprep.mubr.bf16.mxu0 %v1141_v25 }
 0x361   :  { %1787 = vmatmul.mubr.bf16.gmra.mrb[76].mxu0 %v1142_v57 }
 0x3d4   :  { %v1760_v29 = vpop.f32.mrb[48].mxu0 }
 0x3d5   :  { %v1254_v40 = vadd.f32 %v1760_v29, %v2146_v28  ;;  %v1245_v30 = vpop.f32.mrb[49].mxu0 }
 0x3d6   :  { %v1246_v32 = vadd.f32 %v1245_v30, %v2146_v28  ;;  %v1761_v33 = vpop.f32.mrb[50].mxu0 }
 0x3d7   :  { %1374 = vst [vmem:[#allocation8 + $0x10] sm:$0xff] %v1254_v40  ;;  %v1257_v34 = vadd.f32 %v1761_v33, %v2146_v28  ;;  %v1248_v35 = vpop.f32.mrb[51].mxu0 }
 0x3d8   :  { %1372 = vst [vmem:[#allocation8] sm:$0xff] %v1246_v32  ;;  %v1249_v36 = vadd.f32 %v1248_v35, %v2146_v28 }
 0x3d9   :  { %1375 = vst [vmem:[#allocation8 + $0x18] sm:$0xff] %v1257_v34 }
 0x3da   :  { %1373 = vst [vmem:[#allocation8 + $0x8] sm:$0xff] %v1249_v36 }
 0x3e4   :  { %v1764_v58 = vpop.f32.mrb[52].mxu0 }
 0x3e5   :  { %v1270_v62 = vadd.f32 %v1764_v58, %v2146_v28  ;;  %v1261_v38 = vpop.f32.mrb[53].mxu0 }
 0x3e6   :  { %v1262_v37 = vadd.f32 %v1261_v38, %v2146_v28  ;;  %v1765_v39 = vpop.f32.mrb[54].mxu0 }
 0x3e7   :  { %1378 = vst [vmem:[#allocation8 + $0x30] sm:$0xff] %v1270_v62  ;;  %v1273_v4 = vadd.f32 %v1765_v39, %v2146_v28  ;;  %v1264_v31 = vpop.f32.mrb[55].mxu0 }
 0x3e8   :  { %1376 = vst [vmem:[#allocation8 + $0x20] sm:$0xff] %v1262_v37  ;;  %v1265_v52 = vadd.f32 %v1264_v31, %v2146_v28 }
 0x3e9   :  { %1379 = vst [vmem:[#allocation8 + $0x38] sm:$0xff] %v1273_v4 }
 0x3ea   :  { %1377 = vst [vmem:[#allocation8 + $0x28] sm:$0xff] %v1265_v52 }
 0x3f4   :  { %v1768_v41 = vpop.f32.mrb[56].mxu0 }
 0x3f5   :  { %v1286_v42 = vadd.f32 %v1768_v41, %v2146_v28  ;;  %v1277_v43 = vpop.f32.mrb[57].mxu0 }
 0x3f6   :  { %v1278_v44 = vadd.f32 %v1277_v43, %v2146_v28  ;;  %v1769_v45 = vpop.f32.mrb[58].mxu0 }
 0x3f7   :  { %1382 = vst [vmem:[#allocation8 + $0x50] sm:$0xff] %v1286_v42  ;;  %v1289_v46 = vadd.f32 %v1769_v45, %v2146_v28  ;;  %v1280_v47 = vpop.f32.mrb[59].mxu0 }
 0x3f8   :  { %1380 = vst [vmem:[#allocation8 + $0x40] sm:$0xff] %v1278_v44  ;;  %v1281_v48 = vadd.f32 %v1280_v47, %v2146_v28 }
 0x3f9   :  { %1383 = vst [vmem:[#allocation8 + $0x58] sm:$0xff] %v1289_v46 }
 0x3fa   :  { %1381 = vst [vmem:[#allocation8 + $0x48] sm:$0xff] %v1281_v48 }
 0x404   :  { %v1772_v49 = vpop.f32.mrb[60].mxu0 }
 0x405   :  { %v1302_v50 = vadd.f32 %v1772_v49, %v2146_v28  ;;  %v1293_v51 = vpop.f32.mrb[61].mxu0 }
 0x406   :  { %v1294_v53 = vadd.f32 %v1293_v51, %v2146_v28  ;;  %v1773_v54 = vpop.f32.mrb[62].mxu0 }
 0x407   :  { %1386 = vst [vmem:[#allocation8 + $0x70] sm:$0xff] %v1302_v50  ;;  %v1305_v55 = vadd.f32 %v1773_v54, %v2146_v28  ;;  %v1296_v56 = vpop.f32.mrb[63].mxu0 }
 0x408   :  { %1384 = vst [vmem:[#allocation8 + $0x60] sm:$0xff] %v1294_v53  ;;  %v1297_v59 = vadd.f32 %v1296_v56, %v2146_v28 }
 0x409   :  { %1387 = vst [vmem:[#allocation8 + $0x78] sm:$0xff] %v1305_v55 }
 0x40a   :  { %1385 = vst [vmem:[#allocation8 + $0x68] sm:$0xff] %v1297_v59 }
 0x414   :  { %v1776_v61 = vpop.f32.mrb[64].mxu0 }
 0x415   :  { %v1318_v63 = vadd.f32 %v1776_v61, %v2146_v28  ;;  %v1309_v0 = vpop.f32.mrb[65].mxu0 }
 0x416   :  { %v1310_v1 = vadd.f32 %v1309_v0, %v2146_v28  ;;  %v1777_v2 = vpop.f32.mrb[66].mxu0 }
 0x417   :  { %1390 = vst [vmem:[#allocation8 + $0x90] sm:$0xff] %v1318_v63  ;;  %v1321_v3 = vadd.f32 %v1777_v2, %v2146_v28  ;;  %v1312_v5 = vpop.f32.mrb[67].mxu0 }
 0x418   :  { %1388 = vst [vmem:[#allocation8 + $0x80] sm:$0xff] %v1310_v1  ;;  %v1313_v6 = vadd.f32 %v1312_v5, %v2146_v28 }
 0x419   :  { %1391 = vst [vmem:[#allocation8 + $0x98] sm:$0xff] %v1321_v3 }
 0x41a   :  { %1389 = vst [vmem:[#allocation8 + $0x88] sm:$0xff] %v1313_v6 }
 0x424   :  { %v1780_v7 = vpop.f32.mrb[68].mxu0 }
 0x425   :  { %v1334_v8 = vadd.f32 %v1780_v7, %v2146_v28  ;;  %v1325_v9 = vpop.f32.mrb[69].mxu0 }
 0x426   :  { %v1326_v10 = vadd.f32 %v1325_v9, %v2146_v28  ;;  %v1781_v11 = vpop.f32.mrb[70].mxu0 }
 0x427   :  { %1394 = vst [vmem:[#allocation8 + $0xb0] sm:$0xff] %v1334_v8  ;;  %v1337_v12 = vadd.f32 %v1781_v11, %v2146_v28  ;;  %v1328_v13 = vpop.f32.mrb[71].mxu0 }
 0x428   :  { %1392 = vst [vmem:[#allocation8 + $0xa0] sm:$0xff] %v1326_v10  ;;  %v1329_v14 = vadd.f32 %v1328_v13, %v2146_v28 }
 0x429   :  { %1395 = vst [vmem:[#allocation8 + $0xb8] sm:$0xff] %v1337_v12 }
 0x42a   :  { %1393 = vst [vmem:[#allocation8 + $0xa8] sm:$0xff] %v1329_v14 }
 0x42c   :  { %v1784_v15 = vpop.f32.mrb[72].mxu0 }
 0x42d   :  { %v1350_v16 = vadd.f32 %v1784_v15, %v2146_v28  ;;  %v1341_v17 = vpop.f32.mrb[73].mxu0 }
 0x42e   :  { %v1342_v18 = vadd.f32 %v1341_v17, %v2146_v28  ;;  %v1785_v19 = vpop.f32.mrb[74].mxu0 }
 0x42f   :  { %1398 = vst [vmem:[#allocation8 + $0xd0] sm:$0xff] %v1350_v16  ;;  %v1353_v20 = vadd.f32 %v1785_v19, %v2146_v28  ;;  %v1344_v21 = vpop.f32.mrb[75].mxu0 }
 0x430   :  { %1396 = vst [vmem:[#allocation8 + $0xc0] sm:$0xff] %v1342_v18  ;;  %v1345_v60 = vadd.f32 %v1344_v21, %v2146_v28 }
 0x431   :  { %1399 = vst [vmem:[#allocation8 + $0xd8] sm:$0xff] %v1353_v20 }
 0x432   :  { %1397 = vst [vmem:[#allocation8 + $0xc8] sm:$0xff] %v1345_v60 }
 0x434   :  { %v1788_v22 = vpop.f32.mrb[76].mxu0 }
 0x435   :  { %v1366_v23 = vadd.f32 %v1788_v22, %v2146_v28  ;;  %v1357_v24 = vpop.f32.mrb[77].mxu0 }
 0x436   :  { %v1358_v57 = vadd.f32 %v1357_v24, %v2146_v28  ;;  %v1789_v25 = vpop.f32.mrb[78].mxu0 }
 0x437   :  { %1402 = vst [vmem:[#allocation8 + $0xf0] sm:$0xff] %v1366_v23  ;;  %v1369_v26 = vadd.f32 %v1789_v25, %v2146_v28  ;;  %v1360_v27 = vpop.f32.mrb[79].mxu0 }
 0x438   :  { %1400 = vst [vmem:[#allocation8 + $0xe0] sm:$0xff] %v1358_v57  ;;  %v1361_v29 = vadd.f32 %v1360_v27, %v2146_v28 }
 0x439   :  { %1403 = vst [vmem:[#allocation8 + $0xf8] sm:$0xff] %v1369_v26 }
 0x43a   :  { %1401 = vst [vmem:[#allocation8 + $0xe8] sm:$0xff] %v1361_v29 }
 0x43b   :  { %1934 = shalt.err (!%p1931_p0)
}
 0x43c   :  { %s1935_s27 = scalar_lea.hbm %s2195_s3, 4096 }
 0x43d   :  { %p1936_p1 = scmp.ne.s32.totalorder %s2195_s3, %s1935_s27  ;;  %p1939_p2 = scmp.lt.u32.totalorder %s1935_s27, %s2195_s3 }
 0x43f   :  { %p1941_p3 = pnand %p1939_p2, %p1936_p1 }
 0x441   :  { %1944 = shalt.err (!%p1941_p3)
}
 0x442   :  { %s1959_s5 = smov 128   ;;  %s1960_s6 = smov 8  }
 0x443   :  { %1415 = dma.vmem_to_hbm [thread:$0]  %s1410_s23, 4096, %s2195_s3, [#allocation4], %s1959_s5, %s1959_s5, %s1960_s6  }
 0x444   :  { %1949 = dma.done.wait [#allocation4], 4096  }
 0x445   :  { %1950 = vsyncadd [#allocation4], 4294963200 }
 0x446   :  { %1419 = vsyncpa [#allocation3], 1 }
 0x447   :  { %1420 = vsyncpa [#allocation6], 1 }
 0x448   :  { %1421 = vsyncpa [#allocation4], 1 }

</bundles_post_ra>
